<compile_context>
chip_gen: v5e
topology: v5e:2x2
jax: 0.10.0
libtpu: 0.0.40
codegen_flags: <defaults>
</compile_context>

<pallas_src>
import functools

import jax
import jax.numpy as jnp
from jax import lax
from jax.experimental import pallas as pl
from jax.experimental.pallas import tpu as pltpu


def dssm_kernel(xu_ref, xi_ref, w1u_ref, w1i_ref, b1_ref, w2_ref, b2_ref,
                out_ref, *, h2, eps, matmul_dtype):
    """Fused two-tower DSSM forward for one batch tile.

    xu_ref/xi_ref: (TB, D)       batch-major activations (user / item)
    w1u_ref      : (2*H1, D)     [[W_u1^T], [0]]      (matmul dtype)
    w1i_ref      : (2*H1, D)     [[0], [W_i1^T]]      (matmul dtype)
    b1_ref       : (2*H1, 1)     stacked layer-1 biases (f32)
    w2_ref       : (2*H2, 2*H1)  block-diag(W_u2^T, W_i2^T) (matmul dtype)
    b2_ref       : (2*H2, 1)     stacked layer-2 biases (f32)
    out_ref      : (1, TB)       cosine(u, v), lane-dense
    """
    # Contract the feature axis of the batch-major tiles against the
    # pre-transposed weights: (rows(W), D) x (TB, D) -> (rows(W), TB).
    dn = (((1,), (1,)), ((), ()))

    xu = xu_ref[...].astype(matmul_dtype)
    xi = xi_ref[...].astype(matmul_dtype)

    # Layer 1: the two per-tower products land in disjoint sublane halves
    # (w1u is zero in its bottom half, w1i in its top half), so the add stacks
    # both towers into the fused (2*H1, TB) activation without any concat.
    h = (lax.dot_general(w1u_ref[...], xu, dn,
                         preferred_element_type=jnp.float32)
         + lax.dot_general(w1i_ref[...], xi, dn,
                           preferred_element_type=jnp.float32))
    h = jnp.maximum(h + b1_ref[...], 0.0)                       # ReLU, f32

    # Layer 2: fused block-diagonal weight -> single MXU matmul.
    e = jnp.dot(w2_ref[...], h.astype(matmul_dtype),
                preferred_element_type=jnp.float32)
    e = jnp.tanh(e + b2_ref[...])                               # (2*H2, TB)

    # Split stacked embeddings along sublanes (h2 asserted multiple of 8).
    u = e[:h2, :]                                               # (H2, TB)
    v = e[h2:, :]                                               # (H2, TB)

    uv = jnp.sum(u * v, axis=0, keepdims=True)
    uu = jnp.sum(u * u, axis=0, keepdims=True)
    vv = jnp.sum(v * v, axis=0, keepdims=True)
    # eps inside the sqrt: matches the in-file reference (not torch's clamp).
    out_ref[...] = uv * jax.lax.rsqrt(uu * vv + eps)            # single EUP rsqrt


def dssm_prepare_params(params, matmul_dtype=jnp.bfloat16):
    """Build fused, pre-transposed weights ONCE (hoisted out of forward)."""
    (wu1, bu1, wu2, bu2, wi1, bi1, wi2, bi2) = params
    d_in, h1 = wu1.shape
    h2 = wu2.shape[1]
    f32 = jnp.float32

    z1 = jnp.zeros((h1, d_in), matmul_dtype)
    w1u_t = jnp.concatenate([wu1.T.astype(matmul_dtype), z1], axis=0)  # (2H1, D)
    w1i_t = jnp.concatenate([z1, wi1.T.astype(matmul_dtype)], axis=0)  # (2H1, D)
    b1c = jnp.concatenate([bu1, bi1], axis=1).astype(f32).T            # (2H1, 1)

    z2 = jnp.zeros((h2, h1), matmul_dtype)
    w2t = jnp.block([[wu2.T.astype(matmul_dtype), z2],
                     [z2, wi2.T.astype(matmul_dtype)]])                # (2H2, 2H1)
    b2c = jnp.concatenate([bu2, bi2], axis=1).astype(f32).T            # (2H2, 1)

    return (w1u_t, w1i_t, b1c, w2t, b2c)


def dssm_forward(x_user, x_item, prepared, *, tb=512, eps=1e-12,
                 matmul_dtype=jnp.bfloat16):
    """Tiled DSSM forward.  `prepared` comes from dssm_prepare_params()."""
    w1u_t, w1i_t, b1c, w2t, b2c = prepared
    B, d_in = x_user.shape
    assert x_item.shape == (B, d_in)
    assert w1u_t.shape[1] == d_in
    h1 = w1u_t.shape[0] // 2
    h2 = w2t.shape[0] // 2
    assert w2t.shape == (2 * h2, 2 * h1)
    # Sublane-aligned split of the stacked embeddings (f32 packing = 8 rows).
    assert h2 % 8 == 0, "h2 must be a multiple of 8 for an aligned split"

    # Batch tile: multiple of 128 lanes; cap so the grid keeps >= 2 steps
    # (v7x has 2 TensorCores sharding the "parallel" batch axis).
    tb = max(128, (tb // 128) * 128)
    if B > 128:
        two_step_cap = max(128, ((pl.cdiv(B, 2) + 127) // 128) * 128)
        tb = min(tb, two_step_cap)
    grid = (pl.cdiv(B, tb),)

    macs_per_sample = (2 * h1) * (2 * d_in) + (2 * h2) * (2 * h1)
    cost = pl.CostEstimate(
        flops=int(2 * B * macs_per_sample),
        transcendentals=int(B * (2 * h2 + 1)),          # tanh elems + rsqrt
        bytes_accessed=int(
            (x_user.size + x_item.size) * x_user.dtype.itemsize
            + sum(int(a.size) * a.dtype.itemsize for a in prepared)
            + B * 4),
    )

    kernel = functools.partial(dssm_kernel, h2=h2, eps=eps,
                               matmul_dtype=matmul_dtype)

    out = pl.pallas_call(
        kernel,
        out_shape=jax.ShapeDtypeStruct((1, B), jnp.float32),
        grid=grid,
        in_specs=[
            pl.BlockSpec((tb, d_in), lambda i: (i, 0)),   # x_user: batch-tiled
            pl.BlockSpec((tb, d_in), lambda i: (i, 0)),   # x_item: batch-tiled
            pl.BlockSpec(w1u_t.shape, lambda i: (0, 0)),  # weights: VMEM-resident
            pl.BlockSpec(w1i_t.shape, lambda i: (0, 0)),
            pl.BlockSpec(b1c.shape, lambda i: (0, 0)),
            pl.BlockSpec(w2t.shape, lambda i: (0, 0)),
            pl.BlockSpec(b2c.shape, lambda i: (0, 0)),
        ],
        out_specs=pl.BlockSpec((1, tb), lambda i: (0, i)),  # lane-dense scores
        compiler_params=pltpu.CompilerParams(
            dimension_semantics=("parallel",),
        ),
        cost_estimate=cost,
    )(x_user, x_item, w1u_t, w1i_t, b1c, w2t, b2c)

    return out.reshape(B, 1)


def dssm_reference(x_user, x_item, params, *, eps=1e-12):
    """Pure-JAX reference: two MLP towers + cosine similarity."""
    (wu1, bu1, wu2, bu2, wi1, bi1, wi2, bi2) = params

    def tower(x, w1, b1, w2, b2):
        h = jnp.maximum(x @ w1 + b1, 0.0)
        return jnp.tanh(h @ w2 + b2)

    u = tower(x_user, wu1, bu1, wu2, bu2)
    v = tower(x_item, wi1, bi1, wi2, bi2)
    num = jnp.sum(u * v, axis=-1, keepdims=True)
    uu = jnp.sum(u * u, axis=-1, keepdims=True)
    vv = jnp.sum(v * v, axis=-1, keepdims=True)
    return num / jnp.sqrt(uu * vv + eps)


if __name__ == "__main__":
    # Small deterministic shapes; B non-multiple of the tile exercises the
    # ragged (masked) last batch block and a multi-step parallel grid.
    B, D_IN, H1, H2 = 2000, 32, 64, 32

    key = jax.random.PRNGKey(0)
    keys = jax.random.split(key, 6)

    x_user = jax.random.normal(keys[0], (B, D_IN), dtype=jnp.float32)
    x_item = jax.random.normal(keys[1], (B, D_IN), dtype=jnp.float32)

    def init_linear(k, fan_in, fan_out):
        kw, kb = jax.random.split(k)
        scale = 1.0 / jnp.sqrt(jnp.float32(fan_in))
        w = jax.random.uniform(kw, (fan_in, fan_out), jnp.float32, -scale, scale)
        b = jax.random.uniform(kb, (1, fan_out), jnp.float32, -scale, scale)
        return w, b

    wu1, bu1 = init_linear(keys[2], D_IN, H1)
    wu2, bu2 = init_linear(keys[3], H1, H2)
    wi1, bi1 = init_linear(keys[4], D_IN, H1)
    wi2, bi2 = init_linear(keys[5], H1, H2)
    params = (wu1, bu1, wu2, bu2, wi1, bi1, wi2, bi2)

    ref = dssm_reference(x_user, x_item, params)

    # 1) f32 matmul path: tight check against the reference.
    prep_f32 = dssm_prepare_params(params, matmul_dtype=jnp.float32)
    out_f32 = jax.block_until_ready(
        dssm_forward(x_user, x_item, prep_f32, matmul_dtype=jnp.float32))
    assert out_f32.shape == (B, 1), out_f32.shape
    err_f32 = jnp.max(jnp.abs(out_f32 - ref))
    assert jnp.allclose(out_f32, ref, atol=1e-4, rtol=1e-4), (
        f"f32 path mismatch: max abs err {err_f32}")

    # 2) bf16 matmul-operand path (production default): relaxed tolerance.
    prep_bf16 = dssm_prepare_params(params, matmul_dtype=jnp.bfloat16)
    out_bf16 = jax.block_until_ready(
        dssm_forward(x_user, x_item, prep_bf16, matmul_dtype=jnp.bfloat16))
    assert out_bf16.shape == (B, 1), out_bf16.shape
    err_bf16 = jnp.max(jnp.abs(out_bf16 - ref))
    assert bool(jnp.all(jnp.isfinite(out_bf16)))
    assert jnp.allclose(out_bf16, ref, atol=5e-2, rtol=5e-2), (
        f"bf16 path mismatch: max abs err {err_bf16}")

    print("KERNEL_OK")
</pallas_src>

<mosaic_0001>
module attributes {stable_mosaic.version = 11 : i64} {
  func.func @dssm_kernel(%arg0: i32, %arg1: memref<512x32xf32, #tpu.memory_space<vmem>>, %arg2: memref<512x32xf32, #tpu.memory_space<vmem>>, %arg3: memref<128x32xf32, #tpu.memory_space<vmem>>, %arg4: memref<128x32xf32, #tpu.memory_space<vmem>>, %arg5: memref<128x1xf32, #tpu.memory_space<vmem>>, %arg6: memref<64x128xf32, #tpu.memory_space<vmem>>, %arg7: memref<64x1xf32, #tpu.memory_space<vmem>>, %arg8: memref<1x512xf32, #tpu.memory_space<vmem>>) attributes {dimension_semantics = [#tpu.dimension_semantics<parallel>], iteration_bounds = array<i64: 4>, scalar_prefetch = 0 : i64, scratch_operands = 0 : i64, tpu.core_type = #tpu.core_type<tc>, window_params = [{transform_indices = @transform_0, window_bounds = array<i64: 512, 32>}, {transform_indices = @transform_1, window_bounds = array<i64: 512, 32>}, {pipeline_mode = #tpu.pipeline_mode<synchronous>, transform_indices = @transform_2, window_bounds = array<i64: 128, 32>}, {pipeline_mode = #tpu.pipeline_mode<synchronous>, transform_indices = @transform_3, window_bounds = array<i64: 128, 32>}, {pipeline_mode = #tpu.pipeline_mode<synchronous>, transform_indices = @transform_4, window_bounds = array<i64: 128, 1>}, {pipeline_mode = #tpu.pipeline_mode<synchronous>, transform_indices = @transform_5, window_bounds = array<i64: 64, 128>}, {pipeline_mode = #tpu.pipeline_mode<synchronous>, transform_indices = @transform_6, window_bounds = array<i64: 64, 1>}, {transform_indices = @transform_7, window_bounds = array<i64: 1, 512>}]} {
    %c0 = arith.constant 0 : index
    %c0_0 = arith.constant 0 : index
    %0 = vector.load %arg1[%c0, %c0_0] : memref<512x32xf32, #tpu.memory_space<vmem>>, vector<512x32xf32>
    %c0_1 = arith.constant 0 : index
    %c0_2 = arith.constant 0 : index
    %1 = vector.load %arg2[%c0_1, %c0_2] : memref<512x32xf32, #tpu.memory_space<vmem>>, vector<512x32xf32>
    %c0_3 = arith.constant 0 : index
    %c0_4 = arith.constant 0 : index
    %2 = vector.load %arg3[%c0_3, %c0_4] : memref<128x32xf32, #tpu.memory_space<vmem>>, vector<128x32xf32>
    %cst = arith.constant dense<0.000000e+00> : vector<128x512xf32>
    %3 = tpu.matmul %2, %0, %cst {dimension_numbers = #tpu.dot_dimension_numbers<[1], [1], [0], [0], [0, 0, 1, 0], [], []>} : vector<128x32xf32>, vector<512x32xf32>, vector<128x512xf32> -> vector<128x512xf32>
    %c0_5 = arith.constant 0 : index
    %c0_6 = arith.constant 0 : index
    %4 = vector.load %arg4[%c0_5, %c0_6] : memref<128x32xf32, #tpu.memory_space<vmem>>, vector<128x32xf32>
    %cst_7 = arith.constant dense<0.000000e+00> : vector<128x512xf32>
    %5 = tpu.matmul %4, %1, %cst_7 {dimension_numbers = #tpu.dot_dimension_numbers<[1], [1], [0], [0], [0, 0, 1, 0], [], []>} : vector<128x32xf32>, vector<512x32xf32>, vector<128x512xf32> -> vector<128x512xf32>
    %6 = arith.addf %3, %5 : vector<128x512xf32>
    %c0_8 = arith.constant 0 : index
    %c0_9 = arith.constant 0 : index
    %7 = vector.load %arg5[%c0_8, %c0_9] : memref<128x1xf32, #tpu.memory_space<vmem>>, vector<128x1xf32>
    %8 = vector.broadcast %7 : vector<128x1xf32> to vector<128x512xf32>
    %9 = arith.addf %6, %8 : vector<128x512xf32>
    %cst_10 = arith.constant 0.000000e+00 : f32
    %10 = vector.broadcast %cst_10 : f32 to vector<128x512xf32>
    %11 = arith.maximumf %9, %10 : vector<128x512xf32>
    %c0_11 = arith.constant 0 : index
    %c0_12 = arith.constant 0 : index
    %12 = vector.load %arg6[%c0_11, %c0_12] : memref<64x128xf32, #tpu.memory_space<vmem>>, vector<64x128xf32>
    %cst_13 = arith.constant dense<0.000000e+00> : vector<64x512xf32>
    %13 = tpu.matmul %12, %11, %cst_13 {dimension_numbers = #tpu.dot_dimension_numbers<[1], [0], [0], [1], [0, 0, 1, 1], [], []>} : vector<64x128xf32>, vector<128x512xf32>, vector<64x512xf32> -> vector<64x512xf32>
    %c0_14 = arith.constant 0 : index
    %c0_15 = arith.constant 0 : index
    %14 = vector.load %arg7[%c0_14, %c0_15] : memref<64x1xf32, #tpu.memory_space<vmem>>, vector<64x1xf32>
    %15 = vector.broadcast %14 : vector<64x1xf32> to vector<64x512xf32>
    %16 = arith.addf %13, %15 : vector<64x512xf32>
    %17 = math.tanh %16 : vector<64x512xf32>
    %18 = vector.extract_strided_slice %17 {offsets = [0, 0], sizes = [32, 512], strides = [1, 1]} : vector<64x512xf32> to vector<32x512xf32>
    %19 = vector.extract_strided_slice %17 {offsets = [32, 0], sizes = [32, 512], strides = [1, 1]} : vector<64x512xf32> to vector<32x512xf32>
    %20 = arith.mulf %18, %19 : vector<32x512xf32>
    %cst_16 = arith.constant dense<0.000000e+00> : vector<512xf32>
    %21 = vector.multi_reduction <add>, %20, %cst_16 [0] : vector<32x512xf32> to vector<512xf32>
    %22 = vector.shape_cast %21 : vector<512xf32> to vector<1x512xf32>
    %23 = arith.mulf %18, %18 : vector<32x512xf32>
    %cst_17 = arith.constant dense<0.000000e+00> : vector<512xf32>
    %24 = vector.multi_reduction <add>, %23, %cst_17 [0] : vector<32x512xf32> to vector<512xf32>
    %25 = vector.shape_cast %24 : vector<512xf32> to vector<1x512xf32>
    %26 = arith.mulf %19, %19 : vector<32x512xf32>
    %cst_18 = arith.constant dense<0.000000e+00> : vector<512xf32>
    %27 = vector.multi_reduction <add>, %26, %cst_18 [0] : vector<32x512xf32> to vector<512xf32>
    %28 = vector.shape_cast %27 : vector<512xf32> to vector<1x512xf32>
    %29 = arith.mulf %25, %28 : vector<1x512xf32>
    %cst_19 = arith.constant 9.99999996E-13 : f32
    %30 = vector.broadcast %cst_19 : f32 to vector<1x512xf32>
    %31 = arith.addf %29, %30 : vector<1x512xf32>
    %32 = math.rsqrt %31 : vector<1x512xf32>
    %33 = arith.mulf %22, %32 : vector<1x512xf32>
    %c0_20 = arith.constant 0 : index
    %c0_21 = arith.constant 0 : index
    %34 = vector.load %arg8[%c0_20, %c0_21] : memref<1x512xf32, #tpu.memory_space<vmem>>, vector<1x512xf32>
    tpu.vector_store %arg8[%c0_20, %c0_21], %33 {strides = array<i32>} : memref<1x512xf32, #tpu.memory_space<vmem>>, vector<1x512xf32>,
    return
  }
  func.func @transform_0(%arg0: i32) -> (i32, i32) {
    %c0_i32 = arith.constant 0 : i32
    %c0_i32_0 = arith.constant 0 : i32
    return %arg0, %c0_i32 : i32, i32
  }
  func.func @transform_1(%arg0: i32) -> (i32, i32) {
    %c0_i32 = arith.constant 0 : i32
    %c0_i32_0 = arith.constant 0 : i32
    return %arg0, %c0_i32 : i32, i32
  }
  func.func @transform_2(%arg0: i32) -> (i32, i32) {
    %c0_i32 = arith.constant 0 : i32
    %c0_i32_0 = arith.constant 0 : i32
    %c0_i32_1 = arith.constant 0 : i32
    return %c0_i32, %c0_i32_0 : i32, i32
  }
  func.func @transform_3(%arg0: i32) -> (i32, i32) {
    %c0_i32 = arith.constant 0 : i32
    %c0_i32_0 = arith.constant 0 : i32
    %c0_i32_1 = arith.constant 0 : i32
    return %c0_i32, %c0_i32_0 : i32, i32
  }
  func.func @transform_4(%arg0: i32) -> (i32, i32) {
    %c0_i32 = arith.constant 0 : i32
    %c0_i32_0 = arith.constant 0 : i32
    %c0_i32_1 = arith.constant 0 : i32
    return %c0_i32, %c0_i32_0 : i32, i32
  }
  func.func @transform_5(%arg0: i32) -> (i32, i32) {
    %c0_i32 = arith.constant 0 : i32
    %c0_i32_0 = arith.constant 0 : i32
    %c0_i32_1 = arith.constant 0 : i32
    return %c0_i32, %c0_i32_0 : i32, i32
  }
  func.func @transform_6(%arg0: i32) -> (i32, i32) {
    %c0_i32 = arith.constant 0 : i32
    %c0_i32_0 = arith.constant 0 : i32
    %c0_i32_1 = arith.constant 0 : i32
    return %c0_i32, %c0_i32_0 : i32, i32
  }
  func.func @transform_7(%arg0: i32) -> (i32, i32) {
    %c0_i32 = arith.constant 0 : i32
    %c0_i32_0 = arith.constant 0 : i32
    return %c0_i32, %arg0 : i32, i32
  }
}

</mosaic_0001>

<bundles_post_ra>
// kernel: tpu_custom_call.1
= control target key start
LH: loop header
LB: loop body
LE: loop exit
PB: predicated region body
PF: predicated region fallthrough
CT: control target
= control target key end

     0   :  { %12 = vsyncpa [#allocation3], 0  ;;  %s4168_s0 = inlined_call_operand.vmem [shape: f32[2000,32], index: 0, kind: input, shape index: {}]   ;;  %s4169_s1 = inlined_call_operand.vmem [shape: f32[2000,32], index: 1, kind: input, shape index: {}]   ;;  %s4170_s2 = inlined_call_operand.vmem [shape: f32[128,32], index: 2, kind: input, shape index: {}]   ;;  %s4171_s3 = inlined_call_operand.vmem [shape: f32[128,32], index: 3, kind: input, shape index: {}]   ;;  %s4172_s4 = inlined_call_operand.vmem [shape: f32[128,1], index: 4, kind: input, shape index: {}]   ;;  %s4173_s5 = inlined_call_operand.vmem [shape: f32[64,128], index: 5, kind: input, shape index: {}]   ;;  %s4174_s6 = inlined_call_operand.vmem [shape: f32[64,1], index: 6, kind: input, shape index: {}]   ;;  %s4175_s7 = inlined_call_operand.hbm [shape: f32[1,2000], index: 7, kind: output, shape index: {}]  }
   0x1   :  { %14 = vsyncpa [#allocation3 + $0x1], 0  ;;  %s2782_s24 = smov 0   ;;  %s2784_s25 = smov 0  }
   0x2   :  { %s2786_s26 = smov 0   ;;  %s2788_s27 = smov 0  }
   0x3 LB: > { %s2803_s28 = sadd.s32 4294967295, %s2739_s27   ;;  %s2293_s29 = sadd.s32 4294967294, %s2739_s27   ;;  %s2739_s27 = sphi %s2788_s27, %s4362_s27   ;;  %s2735_s26 = sphi %s2786_s26, %s4361_s26   ;;  %s2731_s25 = sphi %s2784_s25, %s4360_s25   ;;  %s2727_s24 = sphi %s2782_s24, %s4359_s24  }
   0x4   : > { %s2807_s30 = sadd.s32 1, %s2739_s27   ;;  %s184_s8 = sadd.s32 1, %s2735_s26 }
   0x5   : > { %s181_s9 = ssub.s32 %s2739_s27, %s2807_s30  ;;  %p194_p0 = scmp.ne.s32.totalorder %s2735_s26, %s2731_s25 }
   0x6   : > { %p182_p1 = scmp.eq.s32.totalorder %s181_s9, 0  ;;  %p195_p2 = scmp.eq.s32.totalorder %s2803_s28, 3 }
   0x7   : > { %p200_p3 = scmp.ne.s32.totalorder %s2731_s25, %s2727_s24  ;;  %p201_p4 = scmp.eq.s32.totalorder %s2293_s29, 3 }
   0x8   : > { %s2818_s10 = scalar_select %p182_p1, %s2735_s26, %s184_s8  }
   0x9   : > { %p2820_p5 = por %p195_p2, %p194_p0  ;;  %p2824_p6 = por %p201_p4, %p200_p3 }
   0xa   : > { %p2296_p7 = scmp.ge.s32.totalorder %s2739_s27, 1  ;;  %p268_p8 = scmp.lt.s32.totalorder %s2739_s27, 5 }
   0xc   : > { %p269_p9 = pnand %p2296_p7, %p268_p8 }
   0xe   : > { %272 = sbr.rel (%p269_p9) target bundleno = 753 (0x2f1), region = 48 }
  0x13   : > { %s2298_s13 = sshll.u32 %s2803_s28, 6  ;;  %vm502_vm0 = vcmask 261120   ;;  %s310_s29 = sand.u32 1, %s2731_s25   ;;  %vm2194_vm13 = vcmask 1040384   ;;  %vm2196_vm14 = vcmask 1042434   ;;  %vm2198_vm15 = vcmask 1041408  }
  0x14   : > { %p318_p10 = scmp.lt.s32.totalorder %s2298_s13, 249  ;;  %s4123_s8 = sshll.u32 %s310_s29, 2 }
  0x15   : > { %s2559_s9 = sshll.u32 %s2803_s28, 2  ;;  %s2207_s19 = scalar_lea.sflag [#allocation3], %s310_s29 }
  0x16   : > { %s4364_s13 = smov (!%p318_p10, %s2298_s13), 249  ;;  %s2217_s28 = scalar_lea.hbm %s4175_s7, %s2559_s9 }
  0x17   : > { %s2299_s14 = sshll.u32 %s4364_s13, 3  ;;  %s2697_s23 = scalar_lea.hbm %s4175_s7, 16 }
  0x18   : > { %s2839_s17 = scalar_lea.vmem %s4169_s1, %s2299_s14  ;;  %s3005_s18 = scalar_lea.vmem %s4168_s0, %s2299_s14 }
  0x19   : > { %v421_v0 = vld [vmem:[%s2839_s17 + $0x78] sm:$0xff]  ;;  %v420_v4 = vld [vmem:[%s2839_s17 + $0x70] sm:$0xff]  ;;  %v419_v8 = vld [vmem:[%s2839_s17 + $0x68] sm:$0xff]  ;;  %s2221_s14 = sshll.u32 %s2217_s28, 4  ;;  %s2222_s14 = int_to_ptr.hbm [resolvable:$true] %s2221_s14 }
  0x1a   : > { %v437_v1 = vld [vmem:[%s2839_s17 + $0xf8] sm:$0xff]  ;;  %2302 = vmatpush.xpose.msk.msra.mxu0 %vm502_vm0, %v421_v0  ;;  %v436_v5 = vld [vmem:[%s2839_s17 + $0xf0] sm:$0xff]  ;;  %v435_v9 = vld [vmem:[%s2839_s17 + $0xe8] sm:$0xff]  ;;  %s2691_s20 = sshra.s32 %s2222_s14, 4  ;;  %s2692_s20 = int_to_ptr.hbm [resolvable:$true] %s2691_s20 }
  0x1b   : > { %v453_v2 = vld [vmem:[%s2839_s17 + $0x178] sm:$0xff]  ;;  %2334 = vmatpush.xpose.msk.msra.mxu1 %vm502_vm0, %v437_v1  ;;  %v452_v6 = vld [vmem:[%s2839_s17 + $0x170] sm:$0xff]  ;;  %v451_v10 = vld [vmem:[%s2839_s17 + $0x168] sm:$0xff]  ;;  %p2698_p0 = scmp.lt.s32.totalorder %s2692_s20, %s4175_s7 }
  0x1c   : > { %v469_v3 = vld [vmem:[%s2839_s17 + $0x1f8] sm:$0xff]  ;;  %2366 = vmatpush.xpose.msk.msra.mxu2 %vm502_vm0, %v453_v2  ;;  %v468_v7 = vld [vmem:[%s2839_s17 + $0x1f0] sm:$0xff]  ;;  %v467_v11 = vld [vmem:[%s2839_s17 + $0x1e8] sm:$0xff] }
  0x1d   : > { %2398 = vmatpush.xpose.msk.msra.mxu3 %vm502_vm0, %v469_v3  ;;  %v418_v12 = vld [vmem:[%s2839_s17 + $0x60] sm:$0xff]  ;;  %v417_v16 = vld [vmem:[%s2839_s17 + $0x58] sm:$0xff]  ;;  %v416_v20 = vld [vmem:[%s2839_s17 + $0x50] sm:$0xff] }
  0x1e   : > { %2303 = vmatpush.xpose.msk.msra.mxu0 %vm502_vm0, %v420_v4  ;;  %v434_v13 = vld [vmem:[%s2839_s17 + $0xe0] sm:$0xff]  ;;  %v433_v17 = vld [vmem:[%s2839_s17 + $0xd8] sm:$0xff]  ;;  %v432_v21 = vld [vmem:[%s2839_s17 + $0xd0] sm:$0xff] }
  0x1f   : > { %2335 = vmatpush.xpose.msk.msra.mxu1 %vm502_vm0, %v436_v5  ;;  %v450_v14 = vld [vmem:[%s2839_s17 + $0x160] sm:$0xff]  ;;  %v449_v18 = vld [vmem:[%s2839_s17 + $0x158] sm:$0xff]  ;;  %v448_v22 = vld [vmem:[%s2839_s17 + $0x150] sm:$0xff] }
  0x20   : > { %2367 = vmatpush.xpose.msk.msra.mxu2 %vm502_vm0, %v452_v6  ;;  %v466_v15 = vld [vmem:[%s2839_s17 + $0x1e0] sm:$0xff]  ;;  %v465_v19 = vld [vmem:[%s2839_s17 + $0x1d8] sm:$0xff]  ;;  %v464_v23 = vld [vmem:[%s2839_s17 + $0x1d0] sm:$0xff] }
  0x21   : > { %2399 = vmatpush.xpose.msk.msra.mxu3 %vm502_vm0, %v468_v7  ;;  %v415_v24 = vld [vmem:[%s2839_s17 + $0x48] sm:$0xff]  ;;  %v414_v28 = vld [vmem:[%s2839_s17 + $0x40] sm:$0xff]  ;;  %v413_v32 = vld [vmem:[%s2839_s17 + $0x38] sm:$0xff] }
  0x22   : > { %2304 = vmatpush.xpose.msk.msra.mxu0 %vm502_vm0, %v419_v8  ;;  %v431_v25 = vld [vmem:[%s2839_s17 + $0xc8] sm:$0xff]  ;;  %v430_v29 = vld [vmem:[%s2839_s17 + $0xc0] sm:$0xff]  ;;  %v429_v33 = vld [vmem:[%s2839_s17 + $0xb8] sm:$0xff] }
  0x23   : > { %2336 = vmatpush.xpose.msk.msra.mxu1 %vm502_vm0, %v435_v9  ;;  %v447_v26 = vld [vmem:[%s2839_s17 + $0x148] sm:$0xff]  ;;  %v446_v30 = vld [vmem:[%s2839_s17 + $0x140] sm:$0xff]  ;;  %v445_v34 = vld [vmem:[%s2839_s17 + $0x138] sm:$0xff] }
  0x24   : > { %2368 = vmatpush.xpose.msk.msra.mxu2 %vm502_vm0, %v451_v10  ;;  %v463_v27 = vld [vmem:[%s2839_s17 + $0x1c8] sm:$0xff]  ;;  %v462_v31 = vld [vmem:[%s2839_s17 + $0x1c0] sm:$0xff]  ;;  %v461_v35 = vld [vmem:[%s2839_s17 + $0x1b8] sm:$0xff] }
  0x25   : > { %2400 = vmatpush.xpose.msk.msra.mxu3 %vm502_vm0, %v467_v11  ;;  %v412_v36 = vld [vmem:[%s2839_s17 + $0x30] sm:$0xff]  ;;  %v411_v40 = vld [vmem:[%s2839_s17 + $0x28] sm:$0xff]  ;;  %v410_v44 = vld [vmem:[%s2839_s17 + $0x20] sm:$0xff] }
  0x26   : > { %2305 = vmatpush.xpose.msk.msra.mxu0 %vm502_vm0, %v418_v12  ;;  %v428_v37 = vld [vmem:[%s2839_s17 + $0xb0] sm:$0xff]  ;;  %v427_v41 = vld [vmem:[%s2839_s17 + $0xa8] sm:$0xff]  ;;  %v426_v45 = vld [vmem:[%s2839_s17 + $0xa0] sm:$0xff] }
  0x27   : > { %2337 = vmatpush.xpose.msk.msra.mxu1 %vm502_vm0, %v434_v13  ;;  %v444_v38 = vld [vmem:[%s2839_s17 + $0x130] sm:$0xff]  ;;  %v443_v42 = vld [vmem:[%s2839_s17 + $0x128] sm:$0xff]  ;;  %v442_v46 = vld [vmem:[%s2839_s17 + $0x120] sm:$0xff] }
  0x28   : > { %2369 = vmatpush.xpose.msk.msra.mxu2 %vm502_vm0, %v450_v14  ;;  %v460_v39 = vld [vmem:[%s2839_s17 + $0x1b0] sm:$0xff]  ;;  %v459_v43 = vld [vmem:[%s2839_s17 + $0x1a8] sm:$0xff]  ;;  %v458_v47 = vld [vmem:[%s2839_s17 + $0x1a0] sm:$0xff] }
  0x29   : > { %2401 = vmatpush.xpose.msk.msra.mxu3 %vm502_vm0, %v466_v15  ;;  %v409_v48 = vld [vmem:[%s2839_s17 + $0x18] sm:$0xff]  ;;  %v408_v52 = vld [vmem:[%s2839_s17 + $0x10] sm:$0xff]  ;;  %v407_v56 = vld [vmem:[%s2839_s17 + $0x8] sm:$0xff] }
  0x2a   : > { %2306 = vmatpush.xpose.msk.msra.mxu0 %vm502_vm0, %v417_v16  ;;  %v425_v49 = vld [vmem:[%s2839_s17 + $0x98] sm:$0xff]  ;;  %v424_v53 = vld [vmem:[%s2839_s17 + $0x90] sm:$0xff]  ;;  %v423_v57 = vld [vmem:[%s2839_s17 + $0x88] sm:$0xff] }
  0x2b   : > { %2338 = vmatpush.xpose.msk.msra.mxu1 %vm502_vm0, %v433_v17  ;;  %v441_v50 = vld [vmem:[%s2839_s17 + $0x118] sm:$0xff]  ;;  %v440_v54 = vld [vmem:[%s2839_s17 + $0x110] sm:$0xff]  ;;  %v439_v58 = vld [vmem:[%s2839_s17 + $0x108] sm:$0xff] }
  0x2c   : > { %2370 = vmatpush.xpose.msk.msra.mxu2 %vm502_vm0, %v449_v18  ;;  %v457_v51 = vld [vmem:[%s2839_s17 + $0x198] sm:$0xff]  ;;  %v456_v55 = vld [vmem:[%s2839_s17 + $0x190] sm:$0xff]  ;;  %v455_v59 = vld [vmem:[%s2839_s17 + $0x188] sm:$0xff] }
  0x2d   : > { %2402 = vmatpush.xpose.msk.msra.mxu3 %vm502_vm0, %v465_v19  ;;  %v406_v60 = vld [vmem:[%s2839_s17] sm:$0xff]  ;;  %v487_v1 = vld [vmem:[%s4171_s3 + $0x8] sm:$0xff]  ;;  %v488_v2 = vld [vmem:[%s4171_s3 + $0x10] sm:$0xff] }
  0x2e   : > { %2307 = vmatpush.xpose.msk.msra.mxu0 %vm502_vm0, %v416_v20  ;;  %v422_v61 = vld [vmem:[%s2839_s17 + $0x80] sm:$0xff]  ;;  %v489_v3 = vld [vmem:[%s4171_s3 + $0x18] sm:$0xff]  ;;  %v356_v9 = vld [vmem:[%s3005_s18 + $0x70] sm:$0xff] }
  0x2f   : > { %2339 = vmatpush.xpose.msk.msra.mxu1 %vm502_vm0, %v432_v21  ;;  %v438_v62 = vld [vmem:[%s2839_s17 + $0x100] sm:$0xff]  ;;  %v357_v5 = vld [vmem:[%s3005_s18 + $0x78] sm:$0xff]  ;;  %v372_v10 = vld [vmem:[%s3005_s18 + $0xf0] sm:$0xff] }
  0x30   : > { %2371 = vmatpush.xpose.msk.msra.mxu2 %vm502_vm0, %v448_v22  ;;  %v454_v63 = vld [vmem:[%s2839_s17 + $0x180] sm:$0xff]  ;;  %v373_v6 = vld [vmem:[%s3005_s18 + $0xf8] sm:$0xff]  ;;  %v388_v11 = vld [vmem:[%s3005_s18 + $0x170] sm:$0xff]  ;;  %s312_s17 = scalar_lea.vmem [#allocation2], %s4123_s8 }
  0x31   : > { %2403 = vmatpush.xpose.msk.msra.mxu3 %vm502_vm0, %v464_v23  ;;  %v486_v0 = vld [vmem:[%s4171_s3] sm:$0xff]  ;;  %v389_v7 = vld [vmem:[%s3005_s18 + $0x178] sm:$0xff]  ;;  %v404_v12 = vld [vmem:[%s3005_s18 + $0x1f0] sm:$0xff]  ;;  %s2219_s13 = sshll.u32 %s312_s17, 4  ;;  %s2220_s13 = int_to_ptr.vmem [resolvable:$true] %s2219_s13 }
  0x32   : > { %2308 = vmatpush.xpose.msk.msra.mxu0 %vm502_vm0, %v415_v24  ;;  %v490_v4 = vld [vmem:[%s4171_s3 + $0x20] sm:$0xff]  ;;  %v405_v8 = vld [vmem:[%s3005_s18 + $0x1f8] sm:$0xff]  ;;  %v491_v13 = vld [vmem:[%s4171_s3 + $0x28] sm:$0xff] }
  0x33   : > { %2340 = vmatpush.xpose.msk.msra.mxu1 %vm502_vm0, %v431_v25  ;;  %v355_v14 = vld [vmem:[%s3005_s18 + $0x68] sm:$0xff]  ;;  %v354_v18 = vld [vmem:[%s3005_s18 + $0x60] sm:$0xff]  ;;  %v492_v22 = vld [vmem:[%s4171_s3 + $0x30] sm:$0xff] }
  0x34   : > { %2372 = vmatpush.xpose.msk.msra.mxu2 %vm502_vm0, %v447_v26  ;;  %v371_v15 = vld [vmem:[%s3005_s18 + $0xe8] sm:$0xff]  ;;  %v370_v19 = vld [vmem:[%s3005_s18 + $0xe0] sm:$0xff]  ;;  %v353_v23 = vld [vmem:[%s3005_s18 + $0x58] sm:$0xff] }
  0x35   : > { %2404 = vmatpush.xpose.msk.msra.mxu3 %vm502_vm0, %v463_v27  ;;  %v387_v16 = vld [vmem:[%s3005_s18 + $0x168] sm:$0xff]  ;;  %v386_v20 = vld [vmem:[%s3005_s18 + $0x160] sm:$0xff]  ;;  %v369_v24 = vld [vmem:[%s3005_s18 + $0xd8] sm:$0xff] }
  0x36   : > { %2309 = vmatpush.xpose.msk.msra.mxu0 %vm502_vm0, %v414_v28  ;;  %v403_v17 = vld [vmem:[%s3005_s18 + $0x1e8] sm:$0xff]  ;;  %v402_v21 = vld [vmem:[%s3005_s18 + $0x1e0] sm:$0xff]  ;;  %v385_v25 = vld [vmem:[%s3005_s18 + $0x158] sm:$0xff] }
  0x37   : > { %2341 = vmatpush.xpose.msk.msra.mxu1 %vm502_vm0, %v430_v29  ;;  %v401_v26 = vld [vmem:[%s3005_s18 + $0x1d8] sm:$0xff]  ;;  %v352_v27 = vld [vmem:[%s3005_s18 + $0x50] sm:$0xff] }
  0x38   : > { %2373 = vmatpush.xpose.msk.msra.mxu2 %vm502_vm0, %v446_v30  ;;  %v368_v28 = vld [vmem:[%s3005_s18 + $0xd0] sm:$0xff] }
  0x39   : > { %2405 = vmatpush.xpose.msk.msra.mxu3 %vm502_vm0, %v462_v31  ;;  %v384_v29 = vld [vmem:[%s3005_s18 + $0x150] sm:$0xff]  ;;  %v493_v31 = vld [vmem:[%s4171_s3 + $0x38] sm:$0xff] }
  0x3a   : > { %2310 = vmatpush.xpose.msk.msra.mxu0 %vm502_vm0, %v413_v32  ;;  %v400_v30 = vld [vmem:[%s3005_s18 + $0x1d0] sm:$0xff]  ;;  %v351_v32 = vld [vmem:[%s3005_s18 + $0x48] sm:$0xff] }
  0x3b   : > { %2342 = vmatpush.xpose.msk.msra.mxu1 %vm502_vm0, %v429_v33  ;;  %v367_v33 = vld [vmem:[%s3005_s18 + $0xc8] sm:$0xff] }
  0x3c   : > { %2374 = vmatpush.xpose.msk.msra.mxu2 %vm502_vm0, %v445_v34  ;;  %v383_v34 = vld [vmem:[%s3005_s18 + $0x148] sm:$0xff] }
  0x3d   : > { %2406 = vmatpush.xpose.msk.msra.mxu3 %vm502_vm0, %v461_v35  ;;  %v399_v35 = vld [vmem:[%s3005_s18 + $0x1c8] sm:$0xff] }
  0x3e   : > { %2311 = vmatpush.xpose.msk.msra.mxu0 %vm502_vm0, %v412_v36  ;;  %v350_v36 = vld [vmem:[%s3005_s18 + $0x40] sm:$0xff] }
  0x3f   : > { %2343 = vmatpush.xpose.msk.msra.mxu1 %vm502_vm0, %v428_v37  ;;  %v366_v37 = vld [vmem:[%s3005_s18 + $0xc0] sm:$0xff] }
  0x40   : > { %2375 = vmatpush.xpose.msk.msra.mxu2 %vm502_vm0, %v444_v38  ;;  %v382_v38 = vld [vmem:[%s3005_s18 + $0x140] sm:$0xff] }
  0x41   : > { %2407 = vmatpush.xpose.msk.msra.mxu3 %vm502_vm0, %v460_v39  ;;  %v398_v39 = vld [vmem:[%s3005_s18 + $0x1c0] sm:$0xff] }
  0x42   : > { %2312 = vmatpush.xpose.msk.msra.mxu0 %vm502_vm0, %v411_v40  ;;  %v494_v40 = vld [vmem:[%s4171_s3 + $0x40] sm:$0xff] }
  0x43   : > { %2344 = vmatpush.xpose.msk.msra.mxu1 %vm502_vm0, %v427_v41  ;;  %v349_v41 = vld [vmem:[%s3005_s18 + $0x38] sm:$0xff] }
  0x44   : > { %2376 = vmatpush.xpose.msk.msra.mxu2 %vm502_vm0, %v443_v42  ;;  %v365_v42 = vld [vmem:[%s3005_s18 + $0xb8] sm:$0xff] }
  0x45   : > { %2408 = vmatpush.xpose.msk.msra.mxu3 %vm502_vm0, %v459_v43  ;;  %v381_v43 = vld [vmem:[%s3005_s18 + $0x138] sm:$0xff] }
  0x46   : > { %2313 = vmatpush.xpose.msk.msra.mxu0 %vm502_vm0, %v410_v44  ;;  %v397_v44 = vld [vmem:[%s3005_s18 + $0x1b8] sm:$0xff] }
  0x47   : > { %2345 = vmatpush.xpose.msk.msra.mxu1 %vm502_vm0, %v426_v45  ;;  %v1518_v45 = vld [vmem:[%s4172_s4 + $0x78] sm:$0xff] }
  0x48   : > { %2377 = vmatpush.xpose.msk.msra.mxu2 %vm502_vm0, %v442_v46  ;;  %v348_v46 = vld [vmem:[%s3005_s18 + $0x30] sm:$0xff] }
  0x49   : > { %2409 = vmatpush.xpose.msk.msra.mxu3 %vm502_vm0, %v458_v47  ;;  %v364_v47 = vld [vmem:[%s3005_s18 + $0xb0] sm:$0xff] }
  0x4a   : > { %2314 = vmatpush.xpose.msk.msra.mxu0 %vm502_vm0, %v409_v48  ;;  %v2741_v48 = vmov 0  }
  0x4b   : > { %2346 = vmatpush.xpose.msk.msra.mxu1 %vm502_vm0, %v425_v49  ;;  %2602 = vset.pattern.permute.xlu0 %v2741_v48  ;;  %v380_v49 = vld [vmem:[%s3005_s18 + $0x130] sm:$0xff] }
  0x4c   : > { %2378 = vmatpush.xpose.msk.msra.mxu2 %vm502_vm0, %v441_v50  ;;  %v396_v50 = vld [vmem:[%s3005_s18 + $0x1b0] sm:$0xff]  ;;  %2603 = vset.pattern.permute.xlu1 %v2741_v48 }
  0x4d   : > { %2410 = vmatpush.xpose.msk.msra.mxu3 %vm502_vm0, %v457_v51  ;;  %v495_v51 = vld [vmem:[%s4171_s3 + $0x48] sm:$0xff]  ;;  %1596 = vperm.xlu0 %2602, %v1518_v45   ;;  %v472_v45 = vld [vmem:[%s4170_s2 + $0x10] sm:$0xff] }
  0x4e   : > { %2315 = vmatpush.xpose.msk.msra.mxu0 %vm502_vm0, %v408_v52  ;;  %2604 = vset.pattern.permute.xlu2 %v2741_v48  ;;  %v347_v52 = vld [vmem:[%s3005_s18 + $0x28] sm:$0xff] }
  0x4f   : > { %2347 = vmatpush.xpose.msk.msra.mxu1 %vm502_vm0, %v424_v53  ;;  %v363_v53 = vld [vmem:[%s3005_s18 + $0xa8] sm:$0xff] }
  0x50   : > { %2379 = vmatpush.xpose.msk.msra.mxu2 %vm502_vm0, %v440_v54  ;;  %v379_v54 = vld [vmem:[%s3005_s18 + $0x128] sm:$0xff] }
  0x51   : > { %2411 = vmatpush.xpose.msk.msra.mxu3 %vm502_vm0, %v456_v55  ;;  %v395_v55 = vld [vmem:[%s3005_s18 + $0x1a8] sm:$0xff] }
  0x52   : > { %2316 = vmatpush.xpose.msk.msra.mxu0 %vm502_vm0, %v407_v56  ;;  %v1517_v56 = vld [vmem:[%s4172_s4 + $0x70] sm:$0xff] }
  0x53   : > { %2348 = vmatpush.xpose.msk.msra.mxu1 %vm502_vm0, %v423_v57  ;;  %v346_v57 = vld [vmem:[%s3005_s18 + $0x20] sm:$0xff] }
  0x54   : > { %2380 = vmatpush.xpose.msk.msra.mxu2 %vm502_vm0, %v439_v58  ;;  %v362_v58 = vld [vmem:[%s3005_s18 + $0xa0] sm:$0xff] }
  0x55   : > { %2412 = vmatpush.xpose.msk.msra.mxu3 %vm502_vm0, %v455_v59  ;;  %v378_v59 = vld [vmem:[%s3005_s18 + $0x120] sm:$0xff]  ;;  %1591 = vperm.xlu0 %2602, %v1517_v56  }
  0x56   : > { %2317 = vmatpush.xpose.msk.msra.mxu0 %vm502_vm0, %v406_v60  ;;  %v394_v60 = vld [vmem:[%s3005_s18 + $0x1a0] sm:$0xff] }
  0x57   : > { %2349 = vmatpush.xpose.msk.msra.mxu1 %vm502_vm0, %v422_v61  ;;  %v496_v61 = vld [vmem:[%s4171_s3 + $0x50] sm:$0xff] }
  0x58   : > { %2381 = vmatpush.xpose.msk.msra.mxu2 %vm502_vm0, %v438_v62  ;;  %v345_v62 = vld [vmem:[%s3005_s18 + $0x18] sm:$0xff] }
  0x59   : > { %2413 = vmatpush.xpose.msk.msra.mxu3 %vm502_vm0, %v454_v63  ;;  %2318 = vmatmul.msk.f32.vlgmr.msra.gmra.mxu0 %vm502_vm0, %v486_v0  ;;  %v361_v63 = vld [vmem:[%s3005_s18 + $0x98] sm:$0xff] }
  0x5a   : > { %2350 = vmatmul.msk.f32.vlgmr.msra.gmra.mxu1 %vm502_vm0, %v486_v0  ;;  %2430 = vmatpush.xpose.msk.msrb.mxu0 %vm502_vm0, %v357_v5  ;;  %v376_v5 = vld [vmem:[%s3005_s18 + $0x110] sm:$0xff] }
  0x5b   : > { %2382 = vmatmul.msk.f32.vlgmr.msra.gmra.mxu2 %vm502_vm0, %v486_v0  ;;  %2462 = vmatpush.xpose.msk.msrb.mxu1 %vm502_vm0, %v373_v6  ;;  %v392_v6 = vld [vmem:[%s3005_s18 + $0x190] sm:$0xff] }
  0x5c   : > { %2414 = vmatmul.msk.f32.vlgmr.msra.gmra.mxu3 %vm502_vm0, %v486_v0  ;;  %2494 = vmatpush.xpose.msk.msrb.mxu2 %vm502_vm0, %v389_v7  ;;  %v377_v0 = vld [vmem:[%s3005_s18 + $0x118] sm:$0xff] }
  0x5d   : > { %2526 = vmatpush.xpose.msk.msrb.mxu3 %vm502_vm0, %v405_v8  ;;  %v497_v7 = vld [vmem:[%s4171_s3 + $0x58] sm:$0xff]  ;;  %v343_v8 = vld [vmem:[%s3005_s18 + $0x8] sm:$0xff] }
  0x5e   : > { %2431 = vmatpush.xpose.msk.msrb.mxu0 %vm502_vm0, %v356_v9  ;;  %v359_v9 = vld [vmem:[%s3005_s18 + $0x88] sm:$0xff] }
  0x5f   : > { %2463 = vmatpush.xpose.msk.msrb.mxu1 %vm502_vm0, %v372_v10  ;;  %v375_v10 = vld [vmem:[%s3005_s18 + $0x108] sm:$0xff] }
  0x60   : > { %2495 = vmatpush.xpose.msk.msrb.mxu2 %vm502_vm0, %v388_v11  ;;  %v391_v11 = vld [vmem:[%s3005_s18 + $0x188] sm:$0xff] }
  0x61   : > { %2319 = vmatmul.msk.f32.gmra.mxu0 %vm502_vm0, %v487_v1  ;;  %2527 = vmatpush.xpose.msk.msrb.mxu3 %vm502_vm0, %v404_v12  ;;  %v1516_v12 = vld [vmem:[%s4172_s4 + $0x68] sm:$0xff] }
  0x62   : > { %2351 = vmatmul.msk.f32.gmra.mxu1 %vm502_vm0, %v487_v1  ;;  %2432 = vmatpush.xpose.msk.msrb.mxu0 %vm502_vm0, %v355_v14  ;;  %v498_v14 = vld [vmem:[%s4171_s3 + $0x60] sm:$0xff] }
  0x63   : > { %2383 = vmatmul.msk.f32.gmra.mxu2 %vm502_vm0, %v487_v1  ;;  %2464 = vmatpush.xpose.msk.msrb.mxu1 %vm502_vm0, %v371_v15  ;;  %v342_v15 = vld [vmem:[%s3005_s18] sm:$0xff] }
  0x64   : > { %2415 = vmatmul.msk.f32.gmra.mxu3 %vm502_vm0, %v487_v1  ;;  %2496 = vmatpush.xpose.msk.msrb.mxu2 %vm502_vm0, %v387_v16  ;;  %v393_v1 = vld [vmem:[%s3005_s18 + $0x198] sm:$0xff]  ;;  %v358_v16 = vld [vmem:[%s3005_s18 + $0x80] sm:$0xff] }
  0x65   : > { %2528 = vmatpush.xpose.msk.msrb.mxu3 %vm502_vm0, %v403_v17  ;;  %1586 = vperm.xlu1 %2603, %v1516_v12   ;;  %v374_v17 = vld [vmem:[%s3005_s18 + $0x100] sm:$0xff] }
  0x66   : > { %2433 = vmatpush.xpose.msk.msrb.mxu0 %vm502_vm0, %v354_v18  ;;  %v390_v18 = vld [vmem:[%s3005_s18 + $0x180] sm:$0xff] }
  0x67   : > { %2465 = vmatpush.xpose.msk.msrb.mxu1 %vm502_vm0, %v370_v19  ;;  %v1515_v19 = vld [vmem:[%s4172_s4 + $0x60] sm:$0xff] }
  0x68   : > { %2497 = vmatpush.xpose.msk.msrb.mxu2 %vm502_vm0, %v386_v20  ;;  %v1506_v20 = vld [vmem:[%s4172_s4 + $0x18] sm:$0xff] }
  0x69   : > { %2320 = vmatmul.msk.f32.gmra.mxu0 %vm502_vm0, %v488_v2  ;;  %2529 = vmatpush.xpose.msk.msrb.mxu3 %vm502_vm0, %v402_v21  ;;  %v499_v21 = vld [vmem:[%s4171_s3 + $0x68] sm:$0xff] }
  0x6a   : > { %2352 = vmatmul.msk.f32.gmra.mxu1 %vm502_vm0, %v488_v2  ;;  %2434 = vmatpush.xpose.msk.msrb.mxu0 %vm502_vm0, %v353_v23  ;;  %v1511_v23 = vld [vmem:[%s4172_s4 + $0x40] sm:$0xff] }
  0x6b   : > { %2384 = vmatmul.msk.f32.gmra.mxu2 %vm502_vm0, %v488_v2  ;;  %2466 = vmatpush.xpose.msk.msrb.mxu1 %vm502_vm0, %v369_v24  ;;  %v1503_v24 = vld [vmem:[%s4172_s4] sm:$0xff] }
  0x6c   : > { %2416 = vmatmul.msk.f32.gmra.mxu3 %vm502_vm0, %v488_v2  ;;  %2498 = vmatpush.xpose.msk.msrb.mxu2 %vm502_vm0, %v385_v25  ;;  %v1512_v2 = vld [vmem:[%s4172_s4 + $0x48] sm:$0xff]  ;;  %v500_v25 = vld [vmem:[%s4171_s3 + $0x70] sm:$0xff] }
  0x6d   : > { %2530 = vmatpush.xpose.msk.msrb.mxu3 %vm502_vm0, %v401_v26  ;;  %1566 = vperm.xlu0 %2602, %v1512_v2   ;;  %v1513_v26 = vld [vmem:[%s4172_s4 + $0x50] sm:$0xff] }
  0x6e   : > { %2435 = vmatpush.xpose.msk.msrb.mxu0 %vm502_vm0, %v352_v27  ;;  %1581 = vperm.xlu1 %2603, %v1515_v19   ;;  %v1508_v27 = vld [vmem:[%s4172_s4 + $0x28] sm:$0xff] }
  0x6f   : > { %2467 = vmatpush.xpose.msk.msrb.mxu1 %vm502_vm0, %v368_v28  ;;  %v501_v28 = vld [vmem:[%s4171_s3 + $0x78] sm:$0xff] }
  0x70   : > { %2499 = vmatpush.xpose.msk.msrb.mxu2 %vm502_vm0, %v384_v29  ;;  %v1510_v29 = vld [vmem:[%s4172_s4 + $0x38] sm:$0xff] }
  0x71   : > { %2321 = vmatmul.msk.f32.gmra.mxu0 %vm502_vm0, %v489_v3  ;;  %2531 = vmatpush.xpose.msk.msrb.mxu3 %vm502_vm0, %v400_v30  ;;  %v1505_v30 = vld [vmem:[%s4172_s4 + $0x10] sm:$0xff] }
  0x72   : > { %2353 = vmatmul.msk.f32.gmra.mxu1 %vm502_vm0, %v489_v3  ;;  %2436 = vmatpush.xpose.msk.msrb.mxu0 %vm502_vm0, %v351_v32 }
  0x73   : > { %2385 = vmatmul.msk.f32.gmra.mxu2 %vm502_vm0, %v489_v3  ;;  %2468 = vmatpush.xpose.msk.msrb.mxu1 %vm502_vm0, %v367_v33  ;;  %v470_v33 = vld [vmem:[%s4170_s2] sm:$0xff] }
  0x74   : > { %2417 = vmatmul.msk.f32.gmra.mxu3 %vm502_vm0, %v489_v3  ;;  %2500 = vmatpush.xpose.msk.msrb.mxu2 %vm502_vm0, %v383_v34  ;;  %v344_v3 = vld [vmem:[%s3005_s18 + $0x10] sm:$0xff] }
  0x75   : > { %2532 = vmatpush.xpose.msk.msrb.mxu3 %vm502_vm0, %v399_v35 }
  0x76   : > { %2437 = vmatpush.xpose.msk.msrb.mxu0 %vm502_vm0, %v350_v36  ;;  %1561 = vperm.xlu1 %2603, %v1511_v23   ;;  %v1507_v36 = vld [vmem:[%s4172_s4 + $0x20] sm:$0xff] }
  0x77   : > { %2469 = vmatpush.xpose.msk.msrb.mxu1 %vm502_vm0, %v366_v37 }
  0x78   : > { %2501 = vmatpush.xpose.msk.msrb.mxu2 %vm502_vm0, %v382_v38 }
  0x79   : > { %2322 = vmatmul.msk.f32.gmra.mxu0 %vm502_vm0, %v490_v4  ;;  %2533 = vmatpush.xpose.msk.msrb.mxu3 %vm502_vm0, %v398_v39  ;;  %v471_v39 = vld [vmem:[%s4170_s2 + $0x8] sm:$0xff] }
  0x7a   : > { %2354 = vmatmul.msk.f32.gmra.mxu1 %vm502_vm0, %v490_v4  ;;  %2438 = vmatpush.xpose.msk.msrb.mxu0 %vm502_vm0, %v349_v41 }
  0x7b   : > { %2386 = vmatmul.msk.f32.gmra.mxu2 %vm502_vm0, %v490_v4  ;;  %2470 = vmatpush.xpose.msk.msrb.mxu1 %vm502_vm0, %v365_v42  ;;  %v1504_v42 = vld [vmem:[%s4172_s4 + $0x8] sm:$0xff] }
  0x7c   : > { %2418 = vmatmul.msk.f32.gmra.mxu3 %vm502_vm0, %v490_v4  ;;  %2502 = vmatpush.xpose.msk.msrb.mxu2 %vm502_vm0, %v381_v43  ;;  %v360_v4 = vld [vmem:[%s3005_s18 + $0x90] sm:$0xff]  ;;  %s2693_s18 = scalar_lea.hbm %s2692_s20, 4 }
  0x7d   : > { %2534 = vmatpush.xpose.msk.msrb.mxu3 %vm502_vm0, %v397_v44  ;;  %p2694_p11 = scmp.ne.s32.totalorder %s2692_s20, %s2693_s18  ;;  %p2699_p1 = scmp.lt.s32.totalorder %s2697_s23, %s2693_s18 }
  0x7e   : > { %2439 = vmatpush.xpose.msk.msrb.mxu0 %vm502_vm0, %v348_v46  ;;  %1546 = vperm.xlu1 %2603, %v1508_v27   ;;  %v1735_v27 = vld [vmem:[%s4174_s6] sm:$0xff] }
  0x7f   : > { %2471 = vmatpush.xpose.msk.msrb.mxu1 %vm502_vm0, %v364_v47  ;;  %p2695_p12 = pnand %p2694_p11, %p2820_p5  ;;  %p2700_p2 = por %p2699_p1, %p2698_p0 }
  0x80   : > { %2503 = vmatpush.xpose.msk.msrb.mxu2 %vm502_vm0, %v380_v49 }
  0x81   : > { %2323 = vmatmul.msk.f32.gmra.mxu0 %vm502_vm0, %v491_v13  ;;  %2535 = vmatpush.xpose.msk.msrb.mxu3 %vm502_vm0, %v396_v50  ;;  %v473_v50 = vld [vmem:[%s4170_s2 + $0x18] sm:$0xff]  ;;  %p2696_p13 = pneg %p2695_p12 }
  0x82   : > { %2355 = vmatmul.msk.f32.gmra.mxu1 %vm502_vm0, %v491_v13  ;;  %2440 = vmatpush.xpose.msk.msrb.mxu0 %vm502_vm0, %v347_v52 }
  0x83   : > { %2387 = vmatmul.msk.f32.gmra.mxu2 %vm502_vm0, %v491_v13  ;;  %2472 = vmatpush.xpose.msk.msrb.mxu1 %vm502_vm0, %v363_v53  ;;  %p2701_p3 = pnand %p2700_p2, %p2696_p13 }
  0x84   : > { %2419 = vmatmul.msk.f32.gmra.mxu3 %vm502_vm0, %v491_v13  ;;  %2504 = vmatpush.xpose.msk.msrb.mxu2 %vm502_vm0, %v379_v54  ;;  %v1509_v13 = vld [vmem:[%s4172_s4 + $0x30] sm:$0xff] }
  0x85   : > { %2536 = vmatpush.xpose.msk.msrb.mxu3 %vm502_vm0, %v395_v55  ;;  %1551 = vperm.xlu0 %2602, %v1509_v13   ;;  %v474_v55 = vld [vmem:[%s4170_s2 + $0x20] sm:$0xff] }
  0x86   : > { %2441 = vmatpush.xpose.msk.msrb.mxu0 %vm502_vm0, %v346_v57  ;;  %1531 = vperm.xlu1 %2603, %v1505_v30  }
  0x87   : > { %2473 = vmatpush.xpose.msk.msrb.mxu1 %vm502_vm0, %v362_v58 }
  0x88   : > { %2505 = vmatpush.xpose.msk.msrb.mxu2 %vm502_vm0, %v378_v59 }
  0x89   : > { %2324 = vmatmul.msk.f32.gmra.mxu0 %vm502_vm0, %v492_v22  ;;  %2537 = vmatpush.xpose.msk.msrb.mxu3 %vm502_vm0, %v394_v60  ;;  %v475_v60 = vld [vmem:[%s4170_s2 + $0x28] sm:$0xff] }
  0x8a   : > { %2356 = vmatmul.msk.f32.gmra.mxu1 %vm502_vm0, %v492_v22  ;;  %2442 = vmatpush.xpose.msk.msrb.mxu0 %vm502_vm0, %v345_v62 }
  0x8b   : > { %2388 = vmatmul.msk.f32.gmra.mxu2 %vm502_vm0, %v492_v22  ;;  %2474 = vmatpush.xpose.msk.msrb.mxu1 %vm502_vm0, %v361_v63 }
  0x8c   : > { %2420 = vmatmul.msk.f32.gmra.mxu3 %vm502_vm0, %v492_v22  ;;  %2506 = vmatpush.xpose.msk.msrb.mxu2 %vm502_vm0, %v377_v0  ;;  %v1514_v22 = vld [vmem:[%s4172_s4 + $0x58] sm:$0xff] }
  0x8d   : > { %2538 = vmatpush.xpose.msk.msrb.mxu3 %vm502_vm0, %v393_v1  ;;  %1536 = vperm.xlu0 %2602, %v1506_v20   ;;  %v476_v1 = vld [vmem:[%s4170_s2 + $0x30] sm:$0xff] }
  0x8e   : > { %2443 = vmatpush.xpose.msk.msrb.mxu0 %vm502_vm0, %v344_v3  ;;  %1576 = vperm.xlu2 %2604, %v1514_v22  }
  0x8f   : > { %2475 = vmatpush.xpose.msk.msrb.mxu1 %vm502_vm0, %v360_v4  ;;  %1745 = vperm.xlu1 %2603, %v1735_v27  }
  0x90   : > { %2507 = vmatpush.xpose.msk.msrb.mxu2 %vm502_vm0, %v376_v5 }
  0x91   : > { %2325 = vmatmul.msk.f32.gmra.mxu0 %vm502_vm0, %v493_v31  ;;  %2539 = vmatpush.xpose.msk.msrb.mxu3 %vm502_vm0, %v392_v6  ;;  %v477_v6 = vld [vmem:[%s4170_s2 + $0x38] sm:$0xff] }
  0x92   : > { %2357 = vmatmul.msk.f32.gmra.mxu1 %vm502_vm0, %v493_v31  ;;  %2444 = vmatpush.xpose.msk.msrb.mxu0 %vm502_vm0, %v343_v8 }
  0x93   : > { %2389 = vmatmul.msk.f32.gmra.mxu2 %vm502_vm0, %v493_v31  ;;  %2476 = vmatpush.xpose.msk.msrb.mxu1 %vm502_vm0, %v359_v9 }
  0x94   : > { %2421 = vmatmul.msk.f32.gmra.mxu3 %vm502_vm0, %v493_v31  ;;  %2508 = vmatpush.xpose.msk.msrb.mxu2 %vm502_vm0, %v375_v10 }
  0x95   : > { %2540 = vmatpush.xpose.msk.msrb.mxu3 %vm502_vm0, %v391_v11  ;;  %1521 = vperm.xlu0 %2602, %v1503_v24   ;;  %v478_v11 = vld [vmem:[%s4170_s2 + $0x40] sm:$0xff] }
  0x96   : > { %2445 = vmatpush.xpose.msk.msrb.mxu0 %vm502_vm0, %v342_v15  ;;  %1571 = vperm.xlu2 %2604, %v1513_v26   ;;  %v481_v26 = vld [vmem:[%s4170_s2 + $0x58] sm:$0xff] }
  0x97   : > { %2477 = vmatpush.xpose.msk.msrb.mxu1 %vm502_vm0, %v358_v16  ;;  %v479_v16 = vld [vmem:[%s4170_s2 + $0x48] sm:$0xff] }
  0x98   : > { %2509 = vmatpush.xpose.msk.msrb.mxu2 %vm502_vm0, %v374_v17 }
  0x99   : > { %2326 = vmatmul.msk.f32.gmra.mxu0 %vm502_vm0, %v494_v40  ;;  %2541 = vmatpush.xpose.msk.msrb.mxu3 %vm502_vm0, %v390_v18 }
  0x9a   : > { %2358 = vmatmul.msk.f32.gmra.mxu1 %vm502_vm0, %v494_v40 }
  0x9b   : > { %2390 = vmatmul.msk.f32.gmra.mxu2 %vm502_vm0, %v494_v40 }
  0x9c   : > { %2422 = vmatmul.msk.f32.gmra.mxu3 %vm502_vm0, %v494_v40 }
  0x9e   : > { %1556 = vperm.xlu2 %2604, %v1510_v29  }
  0xa1   : > { %2327 = vmatmul.msk.f32.gmra.mxu0 %vm502_vm0, %v495_v51 }
  0xa2   : > { %2359 = vmatmul.msk.f32.gmra.mxu1 %vm502_vm0, %v495_v51 }
  0xa3   : > { %2391 = vmatmul.msk.f32.gmra.mxu2 %vm502_vm0, %v495_v51 }
  0xa4   : > { %2423 = vmatmul.msk.f32.gmra.mxu3 %vm502_vm0, %v495_v51 }
  0xa6   : > { %1541 = vperm.xlu2 %2604, %v1507_v36  }
  0xa9   : > { %2328 = vmatmul.msk.f32.gmra.mxu0 %vm502_vm0, %v496_v61 }
  0xaa   : > { %2360 = vmatmul.msk.f32.gmra.mxu1 %vm502_vm0, %v496_v61 }
  0xab   : > { %2392 = vmatmul.msk.f32.gmra.mxu2 %vm502_vm0, %v496_v61 }
  0xac   : > { %2424 = vmatmul.msk.f32.gmra.mxu3 %vm502_vm0, %v496_v61 }
  0xae   : > { %1526 = vperm.xlu2 %2604, %v1504_v42   ;;  %v1740_v42 = vld [vmem:[%s4174_s6 + $0x28] sm:$0xff] }
  0xaf   : > { %1770 = vperm.xlu1 %2603, %v1740_v42  }
  0xb1   : > { %2329 = vmatmul.msk.f32.gmra.mxu0 %vm502_vm0, %v497_v7 }
  0xb2   : > { %2361 = vmatmul.msk.f32.gmra.mxu1 %vm502_vm0, %v497_v7 }
  0xb3   : > { %2393 = vmatmul.msk.f32.gmra.mxu2 %vm502_vm0, %v497_v7 }
  0xb4   : > { %2425 = vmatmul.msk.f32.gmra.mxu3 %vm502_vm0, %v497_v7 }
  0xb9   : > { %2330 = vmatmul.msk.f32.gmra.mxu0 %vm502_vm0, %v498_v14 }
  0xba   : > { %2362 = vmatmul.msk.f32.gmra.mxu1 %vm502_vm0, %v498_v14 }
  0xbb   : > { %2394 = vmatmul.msk.f32.gmra.mxu2 %vm502_vm0, %v498_v14 }
  0xbc   : > { %2426 = vmatmul.msk.f32.gmra.mxu3 %vm502_vm0, %v498_v14 }
  0xc1   : > { %2331 = vmatmul.msk.f32.gmra.mxu0 %vm502_vm0, %v499_v21 }
  0xc2   : > { %2363 = vmatmul.msk.f32.gmra.mxu1 %vm502_vm0, %v499_v21 }
  0xc3   : > { %2395 = vmatmul.msk.f32.gmra.mxu2 %vm502_vm0, %v499_v21 }
  0xc4   : > { %2427 = vmatmul.msk.f32.gmra.mxu3 %vm502_vm0, %v499_v21  ;;  %v480_v21 = vld [vmem:[%s4170_s2 + $0x50] sm:$0xff] }
  0xc9   : > { %2332 = vmatmul.msk.f32.gmra.mxu0 %vm502_vm0, %v500_v25 }
  0xca   : > { %2364 = vmatmul.msk.f32.gmra.mxu1 %vm502_vm0, %v500_v25 }
  0xcb   : > { %2396 = vmatmul.msk.f32.gmra.mxu2 %vm502_vm0, %v500_v25 }
  0xcc   : > { %2428 = vmatmul.msk.f32.gmra.mxu3 %vm502_vm0, %v500_v25 }
  0xd1   : > { %2333 = vmatmul.msk.f32.gmra.mxu0 %vm502_vm0, %v501_v28 }
  0xd2   : > { %2365 = vmatmul.msk.f32.gmra.mxu1 %vm502_vm0, %v501_v28 }
  0xd3   : > { %2397 = vmatmul.msk.f32.gmra.mxu2 %vm502_vm0, %v501_v28 }
  0xd4   : > { %2429 = vmatmul.msk.f32.gmra.mxu3 %vm502_vm0, %v501_v28  ;;  %v1739_v28 = vld [vmem:[%s4174_s6 + $0x20] sm:$0xff] }
  0xd5   : > { %1765 = vperm.xlu0 %2602, %v1739_v28   ;;  %v484_v28 = vld [vmem:[%s4170_s2 + $0x70] sm:$0xff] }
  0xd6   : > { %v3258_v31 = vpop.f32.mrf.mxu0 }
  0xd7   : > { %v3260_v32 = vpop.f32.mrf.mxu1 }
  0xd9   : > { %2446 = vmatmul.msk.f32.vlgmr.msrb.gmra.mxu0 %vm502_vm0, %v470_v33 }
  0xda   : > { %2478 = vmatmul.msk.f32.vlgmr.msrb.gmra.mxu1 %vm502_vm0, %v470_v33 }
  0xdb   : > { %2510 = vmatmul.msk.f32.vlgmr.msrb.gmra.mxu2 %vm502_vm0, %v470_v33 }
  0xdc   : > { %2542 = vmatmul.msk.f32.vlgmr.msrb.gmra.mxu3 %vm502_vm0, %v470_v33 }
  0xde   : > { %v3269_v34 = vpop.f32.mrf.mxu2  ;;  %v3276_v37 = vpop.f32.mrf.mxu0 }
  0xdf   : > { %4191 = vst [vmem:[#allocation5_spill] sm:$0xff] %v3269_v34  ;;  %v3271_v35 = vpop.f32.mrf.mxu3  ;;  %v3278_v38 = vpop.f32.mrf.mxu1  ;;  %v1737_v34 = vld [vmem:[%s4174_s6 + $0x10] sm:$0xff] }
  0xe0   : > { %4192 = vst [vmem:[#allocation6_spill] sm:$0xff] %v3271_v35  ;;  %v485_v35 = vld [vmem:[%s4170_s2 + $0x78] sm:$0xff] }
  0xe1   : > { %2447 = vmatmul.msk.f32.gmra.mxu0 %vm502_vm0, %v471_v39 }
  0xe2   : > { %2479 = vmatmul.msk.f32.gmra.mxu1 %vm502_vm0, %v471_v39 }
  0xe3   : > { %2511 = vmatmul.msk.f32.gmra.mxu2 %vm502_vm0, %v471_v39 }
  0xe4   : > { %2543 = vmatmul.msk.f32.gmra.mxu3 %vm502_vm0, %v471_v39  ;;  %v482_v39 = vld [vmem:[%s4170_s2 + $0x60] sm:$0xff] }
  0xe6   : > { %v3287_v40 = vpop.f32.mrf.mxu2  ;;  %v3294_v43 = vpop.f32.mrf.mxu0 }
  0xe7   : > { %4193 = vst [vmem:[#allocation7_spill] sm:$0xff] %v3287_v40  ;;  %v3289_v41 = vpop.f32.mrf.mxu3  ;;  %v3296_v44 = vpop.f32.mrf.mxu1 }
  0xe8   : > { %4194 = vst [vmem:[#allocation8_spill] sm:$0xff] %v3289_v41 }
  0xe9   : > { %2448 = vmatmul.msk.f32.gmra.mxu0 %vm502_vm0, %v472_v45 }
  0xea   : > { %2480 = vmatmul.msk.f32.gmra.mxu1 %vm502_vm0, %v472_v45 }
  0xeb   : > { %2512 = vmatmul.msk.f32.gmra.mxu2 %vm502_vm0, %v472_v45 }
  0xec   : > { %2544 = vmatmul.msk.f32.gmra.mxu3 %vm502_vm0, %v472_v45  ;;  %v1741_v45 = vld [vmem:[%s4174_s6 + $0x30] sm:$0xff] }
  0xed   : > { %1775 = vperm.xlu0 %2602, %v1741_v45  }
  0xee   : > { %v3305_v46 = vpop.f32.mrf.mxu2  ;;  %v3309_v48 = vpop.f32.mrf.mxu0 }
  0xef   : > { %4195 = vst [vmem:[#allocation9_spill] sm:$0xff] %v3305_v46  ;;  %v3307_v47 = vpop.f32.mrf.mxu3  ;;  %v3311_v49 = vpop.f32.mrf.mxu1 }
  0xf0   : > { %4196 = vst [vmem:[#allocation10_spill] sm:$0xff] %v3307_v47  ;;  %v1742_v47 = vld [vmem:[%s4174_s6 + $0x38] sm:$0xff] }
  0xf1   : > { %2449 = vmatmul.msk.f32.gmra.mxu0 %vm502_vm0, %v473_v50 }
  0xf2   : > { %2481 = vmatmul.msk.f32.gmra.mxu1 %vm502_vm0, %v473_v50 }
  0xf3   : > { %2513 = vmatmul.msk.f32.gmra.mxu2 %vm502_vm0, %v473_v50 }
  0xf4   : > { %2545 = vmatmul.msk.f32.gmra.mxu3 %vm502_vm0, %v473_v50 }
  0xf6   : > { %v3320_v51 = vpop.f32.mrf.mxu2  ;;  %v3324_v53 = vpop.f32.mrf.mxu0 }
  0xf7   : > { %4197 = vst [vmem:[#allocation11_spill] sm:$0xff] %v3320_v51  ;;  %v3322_v52 = vpop.f32.mrf.mxu3  ;;  %v3326_v54 = vpop.f32.mrf.mxu1 }
  0xf8   : > { %4198 = vst [vmem:[#allocation12_spill] sm:$0xff] %v3322_v52 }
  0xf9   : > { %2450 = vmatmul.msk.f32.gmra.mxu0 %vm502_vm0, %v474_v55 }
  0xfa   : > { %2482 = vmatmul.msk.f32.gmra.mxu1 %vm502_vm0, %v474_v55 }
  0xfb   : > { %2514 = vmatmul.msk.f32.gmra.mxu2 %vm502_vm0, %v474_v55 }
  0xfc   : > { %2546 = vmatmul.msk.f32.gmra.mxu3 %vm502_vm0, %v474_v55 }
  0xfe   : > { %v3335_v56 = vpop.f32.mrf.mxu2  ;;  %v3339_v58 = vpop.f32.mrf.mxu0 }
  0xff   : > { %4199 = vst [vmem:[#allocation13_spill] sm:$0xff] %v3335_v56  ;;  %v3337_v57 = vpop.f32.mrf.mxu3  ;;  %v3341_v59 = vpop.f32.mrf.mxu1 }
 0x100   : > { %4200 = vst [vmem:[#allocation14_spill] sm:$0xff] %v3337_v57 }
 0x101   : > { %2451 = vmatmul.msk.f32.gmra.mxu0 %vm502_vm0, %v475_v60 }
 0x102   : > { %2483 = vmatmul.msk.f32.gmra.mxu1 %vm502_vm0, %v475_v60 }
 0x103   : > { %2515 = vmatmul.msk.f32.gmra.mxu2 %vm502_vm0, %v475_v60 }
 0x104   : > { %2547 = vmatmul.msk.f32.gmra.mxu3 %vm502_vm0, %v475_v60 }
 0x106   : > { %v3350_v61 = vpop.f32.mrf.mxu2  ;;  %v3354_v63 = vpop.f32.mrf.mxu0 }
 0x107   : > { %4201 = vst [vmem:[#allocation15_spill] sm:$0xff] %v3350_v61  ;;  %v3352_v62 = vpop.f32.mrf.mxu3  ;;  %v3356_v0 = vpop.f32.mrf.mxu1 }
 0x108   : > { %4202 = vst [vmem:[#allocation16_spill] sm:$0xff] %v3352_v62 }
 0x109   : > { %2452 = vmatmul.msk.f32.gmra.mxu0 %vm502_vm0, %v476_v1 }
 0x10a   : > { %2484 = vmatmul.msk.f32.gmra.mxu1 %vm502_vm0, %v476_v1 }
 0x10b   : > { %2516 = vmatmul.msk.f32.gmra.mxu2 %vm502_vm0, %v476_v1 }
 0x10c   : > { %2548 = vmatmul.msk.f32.gmra.mxu3 %vm502_vm0, %v476_v1 }
 0x10e   : > { %v3365_v2 = vpop.f32.mrf.mxu2  ;;  %v3369_v4 = vpop.f32.mrf.mxu0 }
 0x10f   : > { %4203 = vst [vmem:[#allocation17_spill] sm:$0xff] %v3365_v2  ;;  %v3367_v3 = vpop.f32.mrf.mxu3  ;;  %v3371_v5 = vpop.f32.mrf.mxu1 }
 0x110   : > { %4204 = vst [vmem:[#allocation18_spill] sm:$0xff] %v3367_v3 }
 0x111   : > { %2453 = vmatmul.msk.f32.gmra.mxu0 %vm502_vm0, %v477_v6 }
 0x112   : > { %2485 = vmatmul.msk.f32.gmra.mxu1 %vm502_vm0, %v477_v6 }
 0x113   : > { %2517 = vmatmul.msk.f32.gmra.mxu2 %vm502_vm0, %v477_v6 }
 0x114   : > { %2549 = vmatmul.msk.f32.gmra.mxu3 %vm502_vm0, %v477_v6  ;;  %v483_v6 = vld [vmem:[%s4170_s2 + $0x68] sm:$0xff] }
 0x116   : > { %v3380_v7 = vpop.f32.mrf.mxu2  ;;  %v3384_v9 = vpop.f32.mrf.mxu0 }
 0x117   : > { %4205 = vst [vmem:[#allocation19_spill] sm:$0xff] %v3380_v7  ;;  %v3382_v8 = vpop.f32.mrf.mxu3  ;;  %v3386_v10 = vpop.f32.mrf.mxu1 }
 0x118   : > { %4206 = vst [vmem:[#allocation20_spill] sm:$0xff] %v3382_v8 }
 0x119   : > { %2454 = vmatmul.msk.f32.gmra.mxu0 %vm502_vm0, %v478_v11 }
 0x11a   : > { %2486 = vmatmul.msk.f32.gmra.mxu1 %vm502_vm0, %v478_v11 }
 0x11b   : > { %2518 = vmatmul.msk.f32.gmra.mxu2 %vm502_vm0, %v478_v11 }
 0x11c   : > { %2550 = vmatmul.msk.f32.gmra.mxu3 %vm502_vm0, %v478_v11  ;;  %v1738_v11 = vld [vmem:[%s4174_s6 + $0x18] sm:$0xff] }
 0x11d   : > { %1760 = vperm.xlu1 %2603, %v1738_v11  }
 0x11e   : > { %v3395_v12 = vpop.f32.mrf.mxu2  ;;  %v3399_v14 = vpop.f32.mrf.mxu0 }
 0x11f   : > { %4207 = vst [vmem:[#allocation21_spill] sm:$0xff] %v3395_v12  ;;  %v3397_v13 = vpop.f32.mrf.mxu3  ;;  %v3401_v15 = vpop.f32.mrf.mxu1 }
 0x120   : > { %4208 = vst [vmem:[#allocation22_spill] sm:$0xff] %v3397_v13 }
 0x121   : > { %2455 = vmatmul.msk.f32.gmra.mxu0 %vm502_vm0, %v479_v16 }
 0x122   : > { %2487 = vmatmul.msk.f32.gmra.mxu1 %vm502_vm0, %v479_v16 }
 0x123   : > { %2519 = vmatmul.msk.f32.gmra.mxu2 %vm502_vm0, %v479_v16 }
 0x124   : > { %2551 = vmatmul.msk.f32.gmra.mxu3 %vm502_vm0, %v479_v16 }
 0x126   : > { %v3410_v17 = vpop.f32.mrf.mxu2  ;;  %v3414_v19 = vpop.f32.mrf.mxu0 }
 0x127   : > { %4209 = vst [vmem:[#allocation23_spill] sm:$0xff] %v3410_v17  ;;  %v3412_v18 = vpop.f32.mrf.mxu3  ;;  %v3416_v20 = vpop.f32.mrf.mxu1 }
 0x128   : > { %4210 = vst [vmem:[#allocation24_spill] sm:$0xff] %v3412_v18 }
 0x129   : > { %2456 = vmatmul.msk.f32.gmra.mxu0 %vm502_vm0, %v480_v21 }
 0x12a   : > { %2488 = vmatmul.msk.f32.gmra.mxu1 %vm502_vm0, %v480_v21 }
 0x12b   : > { %2520 = vmatmul.msk.f32.gmra.mxu2 %vm502_vm0, %v480_v21 }
 0x12c   : > { %2552 = vmatmul.msk.f32.gmra.mxu3 %vm502_vm0, %v480_v21 }
 0x12e   : > { %v3425_v22 = vpop.f32.mrf.mxu2  ;;  %v3429_v24 = vpop.f32.mrf.mxu0 }
 0x12f   : > { %4211 = vst [vmem:[#allocation25_spill] sm:$0xff] %v3425_v22  ;;  %v3427_v23 = vpop.f32.mrf.mxu3  ;;  %v3431_v25 = vpop.f32.mrf.mxu1 }
 0x130   : > { %4212 = vst [vmem:[#allocation26_spill] sm:$0xff] %v3427_v23 }
 0x131   : > { %4213 = vst [vmem:[#allocation27_spill] sm:$0xff] %v3429_v24  ;;  %2457 = vmatmul.msk.f32.gmra.mxu0 %vm502_vm0, %v481_v26 }
 0x132   : > { %4214 = vst [vmem:[#allocation28_spill] sm:$0xff] %v3431_v25  ;;  %2489 = vmatmul.msk.f32.gmra.mxu1 %vm502_vm0, %v481_v26 }
 0x133   : > { %2521 = vmatmul.msk.f32.gmra.mxu2 %vm502_vm0, %v481_v26 }
 0x134   : > { %2553 = vmatmul.msk.f32.gmra.mxu3 %vm502_vm0, %v481_v26 }
 0x136   : > { %v3446_v29 = vpop.f32.mrf.mxu2  ;;  %v3450_v33 = vpop.f32.mrf.mxu0 }
 0x137   : > { %4215 = vst [vmem:[#allocation29_spill] sm:$0xff] %v3446_v29  ;;  %v3448_v30 = vpop.f32.mrf.mxu3  ;;  %v3452_v36 = vpop.f32.mrf.mxu1 }
 0x138   : > { %4216 = vst [vmem:[#allocation30_spill] sm:$0xff] %v3448_v30 }
 0x139   : > { %4217 = vst [vmem:[#allocation31_spill] sm:$0xff] %v3450_v33  ;;  %2458 = vmatmul.msk.f32.gmra.mxu0 %vm502_vm0, %v482_v39 }
 0x13a   : > { %4218 = vst [vmem:[#allocation32_spill] sm:$0xff] %v3452_v36  ;;  %2490 = vmatmul.msk.f32.gmra.mxu1 %vm502_vm0, %v482_v39 }
 0x13b   : > { %2522 = vmatmul.msk.f32.gmra.mxu2 %vm502_vm0, %v482_v39 }
 0x13c   : > { %2554 = vmatmul.msk.f32.gmra.mxu3 %vm502_vm0, %v482_v39  ;;  %v1736_v39 = vld [vmem:[%s4174_s6 + $0x8] sm:$0xff] }
 0x13d   : > { %1750 = vperm.xlu2 %2604, %v1736_v39  }
 0x13e   : > { %v3467_v50 = vpop.f32.mrf.mxu2  ;;  %v3471_v60 = vpop.f32.mrf.mxu0 }
 0x13f   : > { %4219 = vst [vmem:[#allocation33_spill] sm:$0xff] %v3467_v50  ;;  %v3469_v55 = vpop.f32.mrf.mxu3  ;;  %v3473_v1 = vpop.f32.mrf.mxu1 }
 0x140   : > { %4220 = vst [vmem:[#allocation34_spill] sm:$0xff] %v3469_v55  ;;  %v3594_v50 = vpop.permute.xlu1 %1586 }
 0x141   : > { %4221 = vst [vmem:[#allocation35_spill] sm:$0xff] %v3473_v1  ;;  %2459 = vmatmul.msk.f32.gmra.mxu0 %vm502_vm0, %v483_v6 }
 0x142   : > { %2491 = vmatmul.msk.f32.gmra.mxu1 %vm502_vm0, %v483_v6  ;;  %4249 = vst [vmem:[#allocation63_spill] sm:$0xff] %v3594_v50 }
 0x143   : > { %2523 = vmatmul.msk.f32.gmra.mxu2 %vm502_vm0, %v483_v6 }
 0x144   : > { %2555 = vmatmul.msk.f32.gmra.mxu3 %vm502_vm0, %v483_v6 }
 0x145   : > { %1755 = vperm.xlu2 %2604, %v1737_v34  }
 0x146   : > { %v3485_v16 = vpop.f32.mrf.mxu2  ;;  %v3489_v26 = vpop.f32.mrf.mxu0 }
 0x147   : > { %4222 = vst [vmem:[#allocation36_spill] sm:$0xff] %v3485_v16  ;;  %v3487_v21 = vpop.f32.mrf.mxu3  ;;  %v3491_v27 = vpop.f32.mrf.mxu1 }
 0x148   : > { %4223 = vst [vmem:[#allocation37_spill] sm:$0xff] %v3487_v21 }
 0x149   : > { %2460 = vmatmul.msk.f32.gmra.mxu0 %vm502_vm0, %v484_v28 }
 0x14a   : > { %2492 = vmatmul.msk.f32.gmra.mxu1 %vm502_vm0, %v484_v28 }
 0x14b   : > { %2524 = vmatmul.msk.f32.gmra.mxu2 %vm502_vm0, %v484_v28 }
 0x14c   : > { %2556 = vmatmul.msk.f32.gmra.mxu3 %vm502_vm0, %v484_v28 }
 0x14d   : > { %1780 = vperm.xlu2 %2604, %v1742_v47  }
 0x14e   : > { %v3503_v42 = vpop.f32.mrf.mxu2  ;;  %v3507_v6 = vpop.f32.mrf.mxu0 }
 0x14f   : > { %4224 = vst [vmem:[#allocation38_spill] sm:$0xff] %v3503_v42  ;;  %v3505_v45 = vpop.f32.mrf.mxu3  ;;  %v3509_v11 = vpop.f32.mrf.mxu1 }
 0x150   : > { %4225 = vst [vmem:[#allocation39_spill] sm:$0xff] %v3505_v45 }
 0x151   : > { %4226 = vst [vmem:[#allocation40_spill] sm:$0xff] %v3507_v6  ;;  %2461 = vmatmul.msk.f32.gmra.mxu0 %vm502_vm0, %v485_v35 }
 0x152   : > { %4227 = vst [vmem:[#allocation41_spill] sm:$0xff] %v3509_v11  ;;  %2493 = vmatmul.msk.f32.gmra.mxu1 %vm502_vm0, %v485_v35 }
 0x153   : > { %2525 = vmatmul.msk.f32.gmra.mxu2 %vm502_vm0, %v485_v35 }
 0x154   : > { %2557 = vmatmul.msk.f32.gmra.mxu3 %vm502_vm0, %v485_v35 }
 0x156   : > { %v3521_v28 = vpop.f32.mrf.mxu2  ;;  %v3525_v41 = vpop.f32.mrf.mxu0 }
 0x157   : > { %4228 = vst [vmem:[#allocation42_spill] sm:$0xff] %v3521_v28  ;;  %v3523_v39 = vpop.f32.mrf.mxu3  ;;  %v3527_v40 = vpop.f32.mrf.mxu1 }
 0x158   : > { %4229 = vst [vmem:[#allocation43_spill] sm:$0xff] %v3523_v39 }
 0x15e   : > { %v3532_v46 = vpop.f32.mrf.mxu2  ;;  %v3536_v51 = vpop.f32.mrf.mxu0 }
 0x15f   : > { %4230 = vst [vmem:[#allocation44_spill] sm:$0xff] %v3532_v46  ;;  %v3534_v52 = vpop.f32.mrf.mxu3  ;;  %v3538_v34 = vpop.f32.mrf.mxu1  ;;  %v1264_v11 = vadd.f32 %v3536_v51, %v3276_v37 }
 0x160   : > { %4231 = vst [vmem:[#allocation45_spill] sm:$0xff] %v3534_v52 }
 0x166   : > { %v3540_v35 = vpop.f32.mrf.mxu2  ;;  %v3544_v56 = vpop.f32.mrf.mxu0 }
 0x167   : > { %4232 = vst [vmem:[#allocation46_spill] sm:$0xff] %v3540_v35  ;;  %v3542_v57 = vpop.f32.mrf.mxu3  ;;  %v3546_v62 = vpop.f32.mrf.mxu1 }
 0x168   : > { %4233 = vst [vmem:[#allocation47_spill] sm:$0xff] %v3542_v57 }
 0x16e   : > { %v3548_v61 = vpop.f32.mrf.mxu2  ;;  %v3552_v47 = vpop.f32.mrf.mxu0 }
 0x16f   : > { %4234 = vst [vmem:[#allocation48_spill] sm:$0xff] %v3548_v61  ;;  %v3550_v3 = vpop.f32.mrf.mxu3  ;;  %v3554_v46 = vpop.f32.mrf.mxu1  ;;  %v1270_v37 = vadd.f32 %v3552_v47, %v3309_v48 }
 0x170   : > { %4235 = vst [vmem:[#allocation49_spill] sm:$0xff] %v3550_v3 }
 0x176   : > { %v3556_v52 = vpop.f32.mrf.mxu2  ;;  %v3560_v8 = vpop.f32.mrf.mxu0 }
 0x177   : > { %4236 = vst [vmem:[#allocation50_spill] sm:$0xff] %v3556_v52  ;;  %v3558_v2 = vpop.f32.mrf.mxu3  ;;  %v3562_v35 = vpop.f32.mrf.mxu1 }
 0x178   : > { %4237 = vst [vmem:[#allocation51_spill] sm:$0xff] %v3558_v2  ;;  %v3580_v2 = vpop.permute.xlu0 %1596 }
 0x179   : > { %4242 = vst [vmem:[#allocation56_spill] sm:$0xff] %v3580_v2 }
 0x17e   : > { %v3564_v57 = vpop.f32.mrf.mxu2  ;;  %v3568_v13 = vpop.f32.mrf.mxu0 }
 0x17f   : > { %4238 = vst [vmem:[#allocation52_spill] sm:$0xff] %v3564_v57  ;;  %v3566_v7 = vpop.f32.mrf.mxu3  ;;  %v3570_v61 = vpop.f32.mrf.mxu1 }
 0x180   : > { %4239 = vst [vmem:[#allocation53_spill] sm:$0xff] %v3566_v7  ;;  %v3590_v55 = vpop.permute.xlu0 %1591 }
 0x181   : > { %4247 = vst [vmem:[#allocation61_spill] sm:$0xff] %v3590_v55 }
 0x186   : > { %v3572_v3 = vpop.f32.mrf.mxu2  ;;  %v3576_v18 = vpop.f32.mrf.mxu0 }
 0x187   : > { %4240 = vst [vmem:[#allocation54_spill] sm:$0xff] %v3572_v3  ;;  %v3574_v12 = vpop.f32.mrf.mxu3  ;;  %v3578_v52 = vpop.f32.mrf.mxu1  ;;  %v1279_v48 = vadd.f32 %v3576_v18, %v3354_v63 }
 0x188   : > { %4241 = vst [vmem:[#allocation55_spill] sm:$0xff] %v3574_v12  ;;  %v3592_v12 = vpop.permute.xlu2 %1576  ;;  %v3604_v21 = vpop.permute.xlu0 %1566 }
 0x189   : > { %4248 = vst [vmem:[#allocation62_spill] sm:$0xff] %v3592_v12  ;;  %v3616_v12 = vpop.permute.xlu1 %1581 }
 0x18a   : > { %4252 = vst [vmem:[#allocation66_spill] sm:$0xff] %v3604_v21 }
 0x18b   : > { %4256 = vst [vmem:[#allocation70_spill] sm:$0xff] %v3616_v12 }
 0x18e   : > { %v3582_v17 = vpop.f32.mrf.mxu2  ;;  %v1281_v57 = vpop.f32.mrf.mxu0 }
 0x18f   : > { %4243 = vst [vmem:[#allocation57_spill] sm:$0xff] %v3582_v17  ;;  %v3584_v23 = vpop.f32.mrf.mxu3  ;;  %v1346_v7 = vpop.f32.mrf.mxu1 }
 0x190   : > { %4244 = vst [vmem:[#allocation58_spill] sm:$0xff] %v3584_v23 }
 0x196   : > { %v3586_v22 = vpop.f32.mrf.mxu2  ;;  %v1284_v29 = vpop.f32.mrf.mxu0 }
 0x197   : > { %4245 = vst [vmem:[#allocation59_spill] sm:$0xff] %v3586_v22  ;;  %v3588_v30 = vpop.f32.mrf.mxu3  ;;  %v1349_v3 = vpop.f32.mrf.mxu1 }
 0x198   : > { %4246 = vst [vmem:[#allocation60_spill] sm:$0xff] %v3588_v30  ;;  %v3606_v22 = vpop.permute.xlu2 %1571 }
 0x199   : > { %4253 = vst [vmem:[#allocation67_spill] sm:$0xff] %v3606_v22 }
 0x19e   : > { %v3596_v39 = vpop.f32.mrf.mxu2  ;;  %v3600_v17 = vpop.f32.mrf.mxu0 }
 0x19f   : > { %4250 = vst [vmem:[#allocation64_spill] sm:$0xff] %v3596_v39  ;;  %v3598_v28 = vpop.f32.mrf.mxu3  ;;  %v3602_v23 = vpop.f32.mrf.mxu1 }
 0x1a0   : > { %4251 = vst [vmem:[#allocation65_spill] sm:$0xff] %v3598_v28  ;;  %v3618_v39 = vpop.permute.xlu0 %1551  ;;  %v3628_v22 = vpop.permute.xlu2 %1556  ;;  %v1353_v47 = vadd.f32 %v3602_v23, %v3401_v15  ;;  %v4278_v15 = vld [vmem:[#allocation28_spill] sm:$0xff] }
 0x1a6   : > { %v3608_v30 = vpop.f32.mrf.mxu2  ;;  %v3612_v45 = vpop.f32.mrf.mxu0 }
 0x1a7   : > { %4254 = vst [vmem:[#allocation68_spill] sm:$0xff] %v3608_v30  ;;  %v3610_v16 = vpop.f32.mrf.mxu3  ;;  %v3614_v42 = vpop.f32.mrf.mxu1 }
 0x1a8   : > { %4255 = vst [vmem:[#allocation69_spill] sm:$0xff] %v3610_v16  ;;  %v3630_v30 = vpop.permute.xlu1 %1561  ;;  %v3640_v33 = vpop.permute.xlu0 %1536 }
 0x1ae   : > { %v3620_v28 = vpop.f32.mrf.mxu2  ;;  %v3624_v2 = vpop.f32.mrf.mxu0 }
 0x1af   : > { %4257 = vst [vmem:[#allocation71_spill] sm:$0xff] %v3620_v28  ;;  %v3622_v50 = vpop.f32.mrf.mxu3  ;;  %v3626_v21 = vpop.f32.mrf.mxu1 }
 0x1b0   : > { %4258 = vst [vmem:[#allocation72_spill] sm:$0xff] %v3622_v50  ;;  %v3642_v28 = vpop.permute.xlu2 %1541  ;;  %v3644_v50 = vpop.permute.xlu1 %1546 }
 0x1b1   : > { %4259 = vst [vmem:[#allocation73_spill] sm:$0xff] %v3624_v2 }
 0x1b2   : > { %4260 = vst [vmem:[#allocation74_spill] sm:$0xff] %v3626_v21 }
 0x1b6   : > { %v3632_v16 = vpop.f32.mrf.mxu2  ;;  %v3636_v36 = vpop.f32.mrf.mxu0 }
 0x1b7   : > { %4261 = vst [vmem:[#allocation75_spill] sm:$0xff] %v3632_v16  ;;  %v3634_v55 = vpop.f32.mrf.mxu3  ;;  %v3638_v12 = vpop.f32.mrf.mxu1  ;;  %v1261_v16 = vadd.f32 %v3525_v41, %v3258_v31 }
 0x1b8   : > { %4262 = vst [vmem:[#allocation76_spill] sm:$0xff] %v3634_v55  ;;  %v1326_v55 = vadd.f32 %v3527_v40, %v3260_v32  ;;  %v1267_v32 = vadd.f32 %v3544_v56, %v3294_v43  ;;  %v1332_v40 = vadd.f32 %v3546_v62, %v3296_v44  ;;  %v1276_v43 = vadd.f32 %v3568_v13, %v3339_v58 }
 0x1b9   : > { %4263 = vst [vmem:[#allocation77_spill] sm:$0xff] %v3636_v36  ;;  %v3654_v36 = vpop.permute.xlu0 %1521  ;;  %v1341_v44 = vadd.f32 %v3570_v61, %v3341_v59  ;;  %v1347_v56 = vadd.f32 %v1346_v7, %v3371_v5  ;;  %v3705_v59 = vadd.f32 %v3640_v33, %v1270_v37  ;;  %v3729_v5 = vadd.f32 %v3618_v39, %v1279_v48  ;;  %v4279_v23 = vld [vmem:[#allocation74_spill] sm:$0xff] }
 0x1ba   : > { %4264 = vst [vmem:[#allocation78_spill] sm:$0xff] %v3638_v12  ;;  %v3656_v12 = vpop.permute.xlu2 %1526  ;;  %v3667_v1 = vadd.f32 %v3654_v36, %v1261_v16  ;;  %v3670_v31 = vadd.f32 %v3654_v36, %v1326_v55  ;;  %v1273_v55 = vadd.f32 %v3560_v8, %v3324_v53  ;;  %v1338_v16 = vadd.f32 %v3562_v35, %v3326_v54 }
 0x1bb   : > { %4267 = vst [vmem:[#allocation81_spill] sm:$0xff] %v3654_v36  ;;  %v1285_v53 = vadd.f32 %v1284_v29, %v3384_v9  ;;  %v1350_v54 = vadd.f32 %v1349_v3, %v3386_v10  ;;  %v3699_v62 = vadd.f32 %v3656_v12, %v1264_v11  ;;  %v3723_v3 = vadd.f32 %v3644_v50, %v1276_v43 }
 0x1bc   : > { %4268 = vst [vmem:[#allocation82_spill] sm:$0xff] %v3656_v12  ;;  %v3717_v63 = vadd.f32 %v3642_v28, %v1273_v55  ;;  %v3738_v9 = vadd.f32 %v3628_v22, %v1347_v56  ;;  %v1288_v35 = vadd.f32 %v3600_v17, %v3399_v14  ;;  %v4276_v14 = vld [vmem:[#allocation27_spill] sm:$0xff]  ;;  %v4277_v17 = vld [vmem:[#allocation73_spill] sm:$0xff]  ;;  %v1359_v48 = vadd.f32 %v4279_v23, %v4278_v15  ;;  %v4289_v23 = vld [vmem:[#allocation62_spill] sm:$0xff] }
 0x1bd   : > { %4269 = vst [vmem:[#allocation83_spill] sm:$0xff] %v3667_v1  ;;  %v3741_v10 = vadd.f32 %v3630_v30, %v1285_v53  ;;  %v3744_v13 = vadd.f32 %v3630_v30, %v1350_v54  ;;  %v4284_v56 = vld [vmem:[#allocation61_spill] sm:$0xff] }
 0x1be   : > { %v3646_v25 = vpop.f32.mrf.mxu2  ;;  %v1299_v2 = vpop.f32.mrf.mxu0  ;;  %4270 = vst [vmem:[#allocation84_spill] sm:$0xff] %v3670_v31 }
 0x1bf   : > { %4265 = vst [vmem:[#allocation79_spill] sm:$0xff] %v3646_v25  ;;  %v3648_v21 = vpop.f32.mrf.mxu3  ;;  %v1364_v24 = vpop.f32.mrf.mxu1  ;;  %v1329_v25 = vadd.f32 %v3538_v34, %v3278_v38  ;;  %v1335_v38 = vadd.f32 %v3554_v46, %v3311_v49  ;;  %v1344_v46 = vadd.f32 %v3578_v52, %v3356_v0  ;;  %v1282_v49 = vadd.f32 %v1281_v57, %v3369_v4 }
 0x1c0   : > { %4266 = vst [vmem:[#allocation80_spill] sm:$0xff] %v3648_v21  ;;  %v3680_v34 = vpop.permute.xlu1 %1531  ;;  %v3720_v0 = vadd.f32 %v3642_v28, %v1338_v16  ;;  %v3726_v4 = vadd.f32 %v3644_v50, %v1341_v44  ;;  %v4275_v16 = vld [vmem:[#allocation41_spill] sm:$0xff]  ;;  %v1294_v44 = vadd.f32 %v4277_v17, %v4276_v14  ;;  %v4288_v17 = vld [vmem:[#allocation63_spill] sm:$0xff] }
 0x1c1   : > { %4271 = vst [vmem:[#allocation85_spill] sm:$0xff] %v3680_v34  ;;  %v3702_v58 = vadd.f32 %v3656_v12, %v1329_v25  ;;  %v3708_v61 = vadd.f32 %v3640_v33, %v1335_v38  ;;  %v3711_v52 = vadd.f32 %v3680_v34, %v1267_v32  ;;  %v3714_v57 = vadd.f32 %v3680_v34, %v1332_v40 }
 0x1c2   : > { %v3732_v7 = vadd.f32 %v3618_v39, %v1344_v46  ;;  %v3735_v8 = vadd.f32 %v3628_v22, %v1282_v49  ;;  %v1291_v32 = vadd.f32 %v3612_v45, %v3414_v19  ;;  %v1356_v40 = vadd.f32 %v3614_v42, %v3416_v20  ;;  %v4280_v19 = vld [vmem:[#allocation31_spill] sm:$0xff]  ;;  %v4281_v45 = vld [vmem:[#allocation77_spill] sm:$0xff]  ;;  %v4282_v20 = vld [vmem:[#allocation32_spill] sm:$0xff] }
 0x1c3   : > { %4272 = vst [vmem:[#allocation86_spill] sm:$0xff] %v3702_v58  ;;  %v1297_v46 = vadd.f32 %v4281_v45, %v4280_v19  ;;  %v4283_v42 = vld [vmem:[#allocation78_spill] sm:$0xff] }
 0x1c4   : > { %v1362_v49 = vadd.f32 %v4283_v42, %v4282_v20  ;;  %v4290_v19 = vld [vmem:[#allocation38_spill] sm:$0xff] }
 0x1c5   : > { %v4292_v42 = vld [vmem:[#allocation70_spill] sm:$0xff] }
 0x1c6   : > { %v3662_v6 = vpop.f32.mrf.mxu2  ;;  %v1302_v41 = vpop.f32.mrf.mxu0  ;;  %v1648_v36 = vadd.f32 %v4292_v42, %v1362_v49  ;;  %v4299_v49 = vld [vmem:[#allocation34_spill] sm:$0xff] }
 0x1c7   : > { %v3664_v21 = vpop.f32.mrf.mxu3  ;;  %v1367_v51 = vpop.f32.mrf.mxu1  ;;  %v1303_v18 = vadd.f32 %v1302_v41, %v3489_v26  ;;  %v1300_v26 = vadd.f32 %v1299_v2, %v3471_v60  ;;  %v4273_v41 = vld [vmem:[#allocation35_spill] sm:$0xff]  ;;  %v4285_v60 = vld [vmem:[#allocation56_spill] sm:$0xff] }
 0x1c8   : > { %v1368_v25 = vadd.f32 %v1367_v51, %v3491_v27  ;;  %v1365_v27 = vadd.f32 %v1364_v24, %v4273_v41  ;;  %v4274_v51 = vld [vmem:[#allocation40_spill] sm:$0xff] }
 0x1c9   : > { %v1655_v2 = vadd.f32 %v4284_v56, %v1303_v18  ;;  %v1651_v18 = vadd.f32 %v4288_v17, %v1300_v26 }
 0x1ca   : > { %v1656_v24 = vadd.f32 %v4284_v56, %v1368_v25  ;;  %v1652_v25 = vadd.f32 %v4288_v17, %v1365_v27  ;;  %v4293_v27 = vld [vmem:[#allocation36_spill] sm:$0xff] }
 0x1cb   : > { %v1715_v34 = vmax.f32 %v1651_v18, 0.0 }
 0x1cc   : > { %v1720_v12 = vmax.f32 %v1656_v24, 0.0  ;;  %v1716_v58 = vmax.f32 %v1652_v25, 0.0 }
 0x1ce   : > { %v1432_v29 = vpop.f32.mrf.mxu2  ;;  %v1305_v37 = vpop.f32.mrf.mxu0 }
 0x1cf   : > { %v1497_v11 = vpop.f32.mrf.mxu3  ;;  %v1370_v38 = vpop.f32.mrf.mxu1  ;;  %v1306_v55 = vadd.f32 %v1305_v37, %v4274_v51  ;;  %v4286_v37 = vld [vmem:[#allocation66_spill] sm:$0xff]  ;;  %v4287_v51 = vld [vmem:[#allocation67_spill] sm:$0xff]  ;;  %v1433_v45 = vadd.f32 %v1432_v29, %v4290_v19 }
 0x1d0   : > { %v1371_v43 = vadd.f32 %v1370_v38, %v4275_v16  ;;  %v3773_v38 = vadd.f32 %v4286_v37, %v1288_v35  ;;  %v3776_v41 = vadd.f32 %v4286_v37, %v1353_v47  ;;  %v3779_v16 = vadd.f32 %v4287_v51, %v1291_v32  ;;  %v4291_v47 = vld [vmem:[#allocation39_spill] sm:$0xff] }
 0x1d1   : > { %v1659_v53 = vadd.f32 %v4285_v60, %v1306_v55  ;;  %v3782_v14 = vadd.f32 %v4287_v51, %v1356_v40  ;;  %v1644_v35 = vadd.f32 %v4289_v23, %v1359_v48  ;;  %v1498_v20 = vadd.f32 %v1497_v11, %v4291_v47  ;;  %v4296_v19 = vld [vmem:[#allocation43_spill] sm:$0xff]  ;;  %v4297_v47 = vld [vmem:[#allocation33_spill] sm:$0xff] }
 0x1d2   : > { %v1660_v54 = vadd.f32 %v4285_v60, %v1371_v43  ;;  %v1643_v43 = vadd.f32 %v4289_v23, %v1294_v44  ;;  %v1647_v32 = vadd.f32 %v4292_v42, %v1297_v46  ;;  %v1719_v40 = vmax.f32 %v1655_v2, 0.0  ;;  %v4294_v44 = vld [vmem:[#allocation37_spill] sm:$0xff]  ;;  %v4298_v46 = vld [vmem:[#allocation79_spill] sm:$0xff]  ;;  %v4300_v2 = vld [vmem:[#allocation80_spill] sm:$0xff] }
 0x1d3   : > { %v1723_v15 = vmax.f32 %v1659_v53, 0.0  ;;  %v1430_v53 = vadd.f32 %v3662_v6, %v4293_v27  ;;  %v1495_v48 = vadd.f32 %v3664_v21, %v4294_v44  ;;  %v1427_v1 = vadd.f32 %v4298_v46, %v4297_v47  ;;  %v4303_v44 = vld [vmem:[#allocation30_spill] sm:$0xff] }
 0x1d4   : > { %v1724_v55 = vmax.f32 %v1660_v54, 0.0  ;;  %v4295_v54 = vld [vmem:[#allocation42_spill] sm:$0xff]  ;;  %v1492_v24 = vadd.f32 %v4300_v2, %v4299_v49  ;;  %v1658_v6 = vadd.f32 %v4284_v56, %v1498_v20  ;;  %v1711_v47 = vmax.f32 %v1647_v32, 0.0  ;;  %v4306_v20 = vld [vmem:[#allocation71_spill] sm:$0xff] }
 0x1d5   : > { %1783 = vmatpush.msra.mxu0 %v1723_v15  ;;  %v1657_v15 = vadd.f32 %v4284_v56, %v1433_v45  ;;  %v1712_v46 = vmax.f32 %v1648_v36, 0.0  ;;  %v1654_v18 = vadd.f32 %v4288_v17, %v1495_v48  ;;  %v4305_v45 = vld [vmem:[#allocation25_spill] sm:$0xff]  ;;  %v1707_v49 = vmax.f32 %v1643_v43, 0.0 }
 0x1d6   : > { %v1435_v31 = vpop.f32.mrf.mxu2  ;;  %1824 = vmatpush.msra.mxu1 %v1724_v55  ;;  %v4301_v55 = vld [vmem:[#allocation29_spill] sm:$0xff]  ;;  %v1708_v2 = vmax.f32 %v1644_v35, 0.0  ;;  %v1649_v36 = vadd.f32 %v4292_v42, %v1427_v1  ;;  %v1722_v32 = vmax.f32 %v1658_v6, 0.0  ;;  %v1704_v43 = vmax.f32 %v3782_v14, 0.0  ;;  %v4314_v6 = vld [vmem:[#allocation64_spill] sm:$0xff] }
 0x1d7   : > { %v1500_v26 = vpop.f32.mrf.mxu3  ;;  %v1436_v29 = vadd.f32 %v1435_v31, %v4295_v54  ;;  %1784 = vmatpush.msra.mxu0 %v1719_v40  ;;  %v4304_v54 = vld [vmem:[#allocation76_spill] sm:$0xff]  ;;  %v1421_v40 = vadd.f32 %v4306_v20, %v4305_v45  ;;  %v1700_v14 = vmax.f32 %v3776_v41, 0.0  ;;  %v1696_v41 = vmax.f32 %v3744_v13, 0.0 }
 0x1d8   : > { %v1501_v11 = vadd.f32 %v1500_v26, %v4296_v19  ;;  %1825 = vmatpush.msra.mxu1 %v1720_v12  ;;  %v4302_v26 = vld [vmem:[#allocation75_spill] sm:$0xff]  ;;  %v1489_v19 = vadd.f32 %v4304_v54, %v4303_v44  ;;  %v1653_v12 = vadd.f32 %v4288_v17, %v1430_v53  ;;  %v4310_v53 = vld [vmem:[#allocation68_spill] sm:$0xff]  ;;  %v4315_v54 = vld [vmem:[#allocation22_spill] sm:$0xff]  ;;  %v1692_v13 = vmax.f32 %v3738_v9, 0.0 }
 0x1d9   : > { %v1661_v21 = vadd.f32 %v4285_v60, %v1436_v29  ;;  %v1424_v27 = vadd.f32 %v4302_v26, %v4301_v55  ;;  %1785 = vmatpush.msra.mxu0 %v1715_v34  ;;  %v4308_v29 = vld [vmem:[#allocation72_spill] sm:$0xff]  ;;  %v1650_v34 = vadd.f32 %v4292_v42, %v1492_v24  ;;  %v4309_v17 = vld [vmem:[#allocation23_spill] sm:$0xff]  ;;  %v1703_v26 = vmax.f32 %v3779_v16, 0.0 }
 0x1da   : > { %v1662_v31 = vadd.f32 %v4285_v60, %v1501_v11  ;;  %1826 = vmatpush.msra.mxu1 %v1716_v58  ;;  %v4307_v60 = vld [vmem:[#allocation26_spill] sm:$0xff]  ;;  %v1721_v58 = vmax.f32 %v1657_v15, 0.0  ;;  %v1418_v48 = vadd.f32 %v4310_v53, %v4309_v17  ;;  %v1646_v35 = vadd.f32 %v4289_v23, %v1489_v19  ;;  %v4313_v15 = vld [vmem:[#allocation21_spill] sm:$0xff]  ;;  %v4319_v45 = vld [vmem:[#allocation20_spill] sm:$0xff] }
 0x1db   : > { %v1725_v25 = vmax.f32 %v1661_v21, 0.0  ;;  %v1486_v11 = vadd.f32 %v4308_v29, %v4307_v60  ;;  %1786 = vmatpush.msra.mxu0 %v1711_v47  ;;  %v4311_v21 = vld [vmem:[#allocation24_spill] sm:$0xff]  ;;  %v1645_v1 = vadd.f32 %v4289_v23, %v1424_v27  ;;  %v1717_v42 = vmax.f32 %v1653_v12, 0.0  ;;  %v4316_v47 = vld [vmem:[#allocation65_spill] sm:$0xff] }
 0x1dc   : > { %v1726_v56 = vmax.f32 %v1662_v31, 0.0  ;;  %1827 = vmatpush.msra.mxu1 %v1712_v46  ;;  %v4312_v31 = vld [vmem:[#allocation69_spill] sm:$0xff]  ;;  %v1718_v24 = vmax.f32 %v1654_v18, 0.0  ;;  %v1415_v44 = vadd.f32 %v4314_v6, %v4313_v15  ;;  %v1480_v46 = vadd.f32 %v4316_v47, %v4315_v54  ;;  %v4317_v18 = vld [vmem:[#allocation19_spill] sm:$0xff]  ;;  %v4320_v20 = vld [vmem:[#allocation60_spill] sm:$0xff] }
 0x1dd   : > { %1865 = vmatpush.msra.mxu2 %v1725_v25  ;;  %v1483_v55 = vadd.f32 %v4312_v31, %v4311_v21  ;;  %1787 = vmatpush.msra.mxu0 %v1707_v49  ;;  %v1699_v16 = vmax.f32 %v3773_v38, 0.0  ;;  %v1641_v27 = vadd.f32 %v4287_v51, %v1421_v40  ;;  %v1642_v23 = vadd.f32 %v4287_v51, %v1486_v11  ;;  %v4318_v25 = vld [vmem:[#allocation59_spill] sm:$0xff]  ;;  %v4321_v49 = vld [vmem:[#allocation17_spill] sm:$0xff]  ;;  %v4326_v31 = vld [vmem:[#allocation54_spill] sm:$0xff] }
 0x1de   : > { %1906 = vmatpush.msra.mxu3 %v1726_v56  ;;  %1828 = vmatpush.msra.mxu1 %v1708_v2  ;;  %v1713_v19 = vmax.f32 %v1649_v36, 0.0  ;;  %v1714_v12 = vmax.f32 %v1650_v34, 0.0  ;;  %v1412_v56 = vadd.f32 %v4318_v25, %v4317_v18  ;;  %v1477_v60 = vadd.f32 %v4320_v20, %v4319_v45  ;;  %v4322_v2 = vld [vmem:[#allocation57_spill] sm:$0xff]  ;;  %v4323_v34 = vld [vmem:[#allocation18_spill] sm:$0xff]  ;;  %v4325_v21 = vld [vmem:[#allocation15_spill] sm:$0xff] }
 0x1df   : > { %1866 = vmatpush.msra.mxu2 %v1721_v58  ;;  %1788 = vmatpush.msra.mxu0 %v1703_v26  ;;  %v1695_v38 = vmax.f32 %v3741_v10, 0.0  ;;  %v1637_v40 = vadd.f32 %v4286_v37, %v1418_v48  ;;  %v1638_v51 = vadd.f32 %v4286_v37, %v1483_v55  ;;  %v1709_v29 = vmax.f32 %v1645_v1, 0.0  ;;  %v4324_v58 = vld [vmem:[#allocation58_spill] sm:$0xff]  ;;  %v4327_v26 = vld [vmem:[#allocation16_spill] sm:$0xff]  ;;  %v4329_v15 = vld [vmem:[#allocation13_spill] sm:$0xff] }
 0x1e0   : > { %1907 = vmatpush.msra.mxu3 %v1722_v32  ;;  %1829 = vmatpush.msra.mxu1 %v1704_v43  ;;  %v1710_v11 = vmax.f32 %v1646_v35, 0.0  ;;  %v1409_v36 = vadd.f32 %v4322_v2, %v4321_v49  ;;  %v1474_v32 = vadd.f32 %v4324_v58, %v4323_v34  ;;  %v1691_v10 = vmax.f32 %v3735_v8, 0.0  ;;  %v4328_v43 = vld [vmem:[#allocation55_spill] sm:$0xff]  ;;  %v4330_v6 = vld [vmem:[#allocation52_spill] sm:$0xff]  ;;  %v4331_v54 = vld [vmem:[#allocation14_spill] sm:$0xff] }
 0x1e1   : > { %1867 = vmatpush.msra.mxu2 %v1717_v42  ;;  %1789 = vmatpush.msra.mxu0 %v1699_v16  ;;  %v1633_v17 = vadd.f32 %v3630_v30, %v1415_v44  ;;  %v1634_v37 = vadd.f32 %v3630_v30, %v1480_v46  ;;  %v1705_v53 = vmax.f32 %v1641_v27, 0.0  ;;  %v1706_v48 = vmax.f32 %v1642_v23, 0.0  ;;  %v4332_v47 = vld [vmem:[#allocation53_spill] sm:$0xff]  ;;  %v4333_v23 = vld [vmem:[#allocation11_spill] sm:$0xff]  ;;  %v4335_v18 = vld [vmem:[#allocation12_spill] sm:$0xff] }
 0x1e2   : > { %1908 = vmatpush.msra.mxu3 %v1718_v24  ;;  %1830 = vmatpush.msra.mxu1 %v1700_v14  ;;  %v1406_v55 = vadd.f32 %v4326_v31, %v4325_v21  ;;  %v1471_v1 = vadd.f32 %v4328_v43, %v4327_v26  ;;  %v1687_v8 = vmax.f32 %v3729_v5, 0.0  ;;  %v1688_v9 = vmax.f32 %v3732_v7, 0.0  ;;  %v4336_v25 = vld [vmem:[#allocation51_spill] sm:$0xff]  ;;  %v4342_v58 = vld [vmem:[#allocation46_spill] sm:$0xff]  ;;  %v4345_v21 = vld [vmem:[#allocation5_spill] sm:$0xff] }
 0x1e3   : > { %1868 = vmatpush.msra.mxu2 %v1713_v19  ;;  %1790 = vmatpush.msra.mxu0 %v1695_v38  ;;  %v1629_v35 = vadd.f32 %v3628_v22, %v1412_v56  ;;  %v1630_v30 = vadd.f32 %v3628_v22, %v1477_v60  ;;  %v1701_v42 = vmax.f32 %v1637_v40, 0.0  ;;  %v1702_v24 = vmax.f32 %v1638_v51, 0.0  ;;  %v4334_v19 = vld [vmem:[#allocation50_spill] sm:$0xff]  ;;  %v4337_v38 = vld [vmem:[#allocation9_spill] sm:$0xff]  ;;  %v4341_v34 = vld [vmem:[#allocation7_spill] sm:$0xff] }
 0x1e4   : > { %1909 = vmatpush.msra.mxu3 %v1714_v12  ;;  %1831 = vmatpush.msra.mxu1 %v1696_v41  ;;  %v1403_v44 = vadd.f32 %v4330_v6, %v4329_v15  ;;  %v1468_v46 = vadd.f32 %v4332_v47, %v4331_v54  ;;  %v1683_v5 = vmax.f32 %v3723_v3, 0.0  ;;  %v1684_v7 = vmax.f32 %v3726_v4, 0.0  ;;  %v4338_v41 = vld [vmem:[#allocation48_spill] sm:$0xff]  ;;  %v4339_v51 = vld [vmem:[#allocation10_spill] sm:$0xff]  ;;  %v4348_v43 = vld [vmem:[#allocation45_spill] sm:$0xff] }
 0x1e5   : > { %1869 = vmatpush.msra.mxu2 %v1709_v29  ;;  %1791 = vmatpush.msra.mxu0 %v1691_v10  ;;  %v1625_v16 = vadd.f32 %v3618_v39, %v1409_v36  ;;  %v1626_v22 = vadd.f32 %v3618_v39, %v1474_v32  ;;  %v1697_v14 = vmax.f32 %v1633_v17, 0.0  ;;  %v1698_v27 = vmax.f32 %v1634_v37, 0.0  ;;  %v4340_v29 = vld [vmem:[#allocation49_spill] sm:$0xff]  ;;  %v4343_v10 = vld [vmem:[#allocation8_spill] sm:$0xff]  ;;  %v4347_v26 = vld [vmem:[#allocation6_spill] sm:$0xff] }
 0x1e6   : > { %1910 = vmatpush.msra.mxu3 %v1710_v11  ;;  %1832 = vmatpush.msra.mxu1 %v1692_v13  ;;  %v1400_v12 = vadd.f32 %v4334_v19, %v4333_v23  ;;  %v1465_v56 = vadd.f32 %v4336_v25, %v4335_v18  ;;  %v1679_v3 = vmax.f32 %v3717_v63, 0.0  ;;  %v1680_v4 = vmax.f32 %v3720_v0, 0.0  ;;  %v4344_v13 = vld [vmem:[#allocation47_spill] sm:$0xff]  ;;  %v4346_v31 = vld [vmem:[#allocation44_spill] sm:$0xff]  ;;  %v4353_v54 = vld [vmem:[#allocation82_spill] sm:$0xff] }
 0x1e7   : > { %1870 = vmatpush.msra.mxu2 %v1705_v53  ;;  %1792 = vmatpush.msra.mxu0 %v1687_v8  ;;  %v1621_v45 = vadd.f32 %v3644_v50, %v1406_v55  ;;  %v1622_v39 = vadd.f32 %v3644_v50, %v1471_v1  ;;  %v1693_v20 = vmax.f32 %v1629_v35, 0.0  ;;  %v1694_v60 = vmax.f32 %v1630_v30, 0.0  ;;  %v4349_v8 = vld [vmem:[#allocation86_spill] sm:$0xff]  ;;  %v4352_v6 = vld [vmem:[#allocation84_spill] sm:$0xff] }
 0x1e8   : > { %1911 = vmatpush.msra.mxu3 %v1706_v48  ;;  %1833 = vmatpush.msra.mxu1 %v1688_v9  ;;  %v1397_v40 = vadd.f32 %v4338_v41, %v4337_v38  ;;  %v1462_v11 = vadd.f32 %v4340_v29, %v4339_v51  ;;  %v1675_v63 = vmax.f32 %v3705_v59, 0.0  ;;  %v1676_v0 = vmax.f32 %v3708_v61, 0.0  ;;  %v4350_v9 = vld [vmem:[#allocation85_spill] sm:$0xff] }
 0x1e9   : > { %1871 = vmatpush.msra.mxu2 %v1701_v42  ;;  %1793 = vmatpush.msra.mxu0 %v1683_v5  ;;  %v1617_v49 = vadd.f32 %v3642_v28, %v1403_v44  ;;  %v1618_v50 = vadd.f32 %v3642_v28, %v1468_v46  ;;  %v1689_v2 = vmax.f32 %v1625_v16, 0.0  ;;  %v1690_v36 = vmax.f32 %v1626_v22, 0.0  ;;  %v4354_v16 = vld [vmem:[#allocation81_spill] sm:$0xff] }
 0x1ea   : > { %1912 = vmatpush.msra.mxu3 %v1702_v24  ;;  %1834 = vmatpush.msra.mxu1 %v1684_v7  ;;  %v1394_v32 = vadd.f32 %v4342_v58, %v4341_v34  ;;  %v1459_v17 = vadd.f32 %v4344_v13, %v4343_v10  ;;  %v1671_v59 = vmax.f32 %v3711_v52, 0.0  ;;  %v1672_v61 = vmax.f32 %v3714_v57, 0.0  ;;  %v4351_v24 = vld [vmem:[#allocation83_spill] sm:$0xff]  ;;  %v1727_v7 = vld [vmem:[%s4173_s5] sm:$0xff]  ;;  %v1751_v58 = vpop.permute.xlu2 %1750 }
 0x1eb   : > { %1872 = vmatpush.msra.mxu2 %v1697_v14  ;;  %1794 = vmatpush.msra.mxu0 %v1679_v3  ;;  %v1613_v37 = vadd.f32 %v3640_v33, %v1400_v12  ;;  %v1614_v28 = vadd.f32 %v3640_v33, %v1465_v56  ;;  %v1685_v53 = vmax.f32 %v1621_v45, 0.0  ;;  %v1686_v48 = vmax.f32 %v1622_v39, 0.0  ;;  %v1728_v56 = vld [vmem:[%s4173_s5 + $0x8] sm:$0xff]  ;;  %v1729_v3 = vld [vmem:[%s4173_s5 + $0x10] sm:$0xff]  ;;  %v1731_v45 = vld [vmem:[%s4173_s5 + $0x20] sm:$0xff] }
 0x1ec   : > { %1913 = vmatpush.msra.mxu3 %v1698_v27  ;;  %1835 = vmatpush.msra.mxu1 %v1680_v4  ;;  %v1391_v55 = vadd.f32 %v4346_v31, %v4345_v21  ;;  %v1456_v1 = vadd.f32 %v4348_v43, %v4347_v26  ;;  %v1667_v52 = vmax.f32 %v3699_v62, 0.0  ;;  %v1668_v57 = vmax.f32 %v4349_v8, 0.0  ;;  %v1730_v4 = vld [vmem:[%s4173_s5 + $0x18] sm:$0xff]  ;;  %v1732_v39 = vld [vmem:[%s4173_s5 + $0x28] sm:$0xff]  ;;  %v3934_v43 = vpop.permute.xlu0 %1765 }
 0x1ed   : > { %1873 = vmatpush.msra.mxu2 %v1693_v20  ;;  %1795 = vmatpush.msra.mxu0 %v1675_v63  ;;  %v1609_v35 = vadd.f32 %v4350_v9, %v1397_v40  ;;  %v1610_v33 = vadd.f32 %v4350_v9, %v1462_v11  ;;  %v1681_v30 = vmax.f32 %v1617_v49, 0.0  ;;  %v1682_v42 = vmax.f32 %v1618_v50, 0.0  ;;  %v1733_v20 = vld [vmem:[%s4173_s5 + $0x30] sm:$0xff]  ;;  %v1746_v49 = vpop.permute.xlu1 %1745 }
 0x1ee   : > { %1914 = vmatpush.msra.mxu3 %v1694_v60  ;;  %1836 = vmatpush.msra.mxu1 %v1676_v0  ;;  %v1663_v15 = vmax.f32 %v4351_v24, 0.0  ;;  %v1664_v44 = vmax.f32 %v4352_v6, 0.0  ;;  %v1605_v47 = vadd.f32 %v4353_v54, %v1394_v32  ;;  %v1606_v62 = vadd.f32 %v4353_v54, %v1459_v17  ;;  %v1734_v60 = vld [vmem:[%s4173_s5 + $0x38] sm:$0xff] }
 0x1ef   : > { %1874 = vmatpush.msra.mxu2 %v1689_v2  ;;  %1796 = vmatpush.msra.mxu0 %v1671_v59  ;;  %v1677_v46 = vmax.f32 %v1613_v37, 0.0  ;;  %v1678_v5 = vmax.f32 %v1614_v28, 0.0  ;;  %v1601_v22 = vadd.f32 %v4354_v16, %v1391_v55  ;;  %v1602_v14 = vadd.f32 %v4354_v16, %v1456_v1 }
 0x1f0   : > { %1915 = vmatpush.msra.mxu3 %v1690_v36  ;;  %1837 = vmatpush.msra.mxu1 %v1672_v61  ;;  %v1673_v27 = vmax.f32 %v1609_v35, 0.0  ;;  %v1674_v23 = vmax.f32 %v1610_v33, 0.0  ;;  %v1669_v19 = vmax.f32 %v1605_v47, 0.0  ;;  %v1670_v12 = vmax.f32 %v1606_v62, 0.0 }
 0x1f1   : > { %1875 = vmatpush.msra.mxu2 %v1685_v53  ;;  %1797 = vmatpush.msra.mxu0 %v1667_v52  ;;  %v1665_v18 = vmax.f32 %v1601_v22, 0.0  ;;  %v1666_v25 = vmax.f32 %v1602_v14, 0.0 }
 0x1f2   : > { %1916 = vmatpush.msra.mxu3 %v1686_v48  ;;  %1838 = vmatpush.msra.mxu1 %v1668_v57  ;;  %v1756_v48 = vpop.permute.xlu2 %1755 }
 0x1f3   : > { %1876 = vmatpush.msra.mxu2 %v1681_v30  ;;  %1798 = vmatpush.msra.mxu0 %v1663_v15 }
 0x1f4   : > { %1917 = vmatpush.msra.mxu3 %v1682_v42  ;;  %1839 = vmatpush.msra.mxu1 %v1664_v44 }
 0x1f5   : > { %1877 = vmatpush.msra.mxu2 %v1677_v46  ;;  %1799 = vmatmul.f32.vlgmr.msra.gmra.mxu0 %v1727_v7  ;;  %v3928_v32 = vpop.permute.xlu1 %1770 }
 0x1f6   : > { %1918 = vmatpush.msra.mxu3 %v1678_v5  ;;  %1840 = vmatmul.f32.vlgmr.msra.gmra.mxu1 %v1727_v7 }
 0x1f7   : > { %1878 = vmatpush.msra.mxu2 %v1673_v27  ;;  %v3960_v27 = vpop.permute.xlu0 %1775 }
 0x1f8   : > { %1919 = vmatpush.msra.mxu3 %v1674_v23 }
 0x1f9   : > { %1879 = vmatpush.msra.mxu2 %v1669_v19 }
 0x1fa   : > { %1920 = vmatpush.msra.mxu3 %v1670_v12 }
 0x1fb   : > { %1880 = vmatpush.msra.mxu2 %v1665_v18 }
 0x1fc   : > { %1921 = vmatpush.msra.mxu3 %v1666_v25  ;;  %1881 = vmatmul.f32.vlgmr.msra.gmra.mxu2 %v1727_v7 }
 0x1fd   : > { %1922 = vmatmul.f32.vlgmr.msra.gmra.mxu3 %v1727_v7  ;;  %1802 = vmatmul.f32.gmra.mxu0 %v1728_v56  ;;  %v3936_v1 = vpop.permute.xlu1 %1760 }
 0x1fe   : > { %1843 = vmatmul.f32.gmra.mxu1 %v1728_v56 }
 0x204   : > { %1884 = vmatmul.f32.gmra.mxu2 %v1728_v56 }
 0x205   : > { %1925 = vmatmul.f32.gmra.mxu3 %v1728_v56  ;;  %1805 = vmatmul.f32.gmra.mxu0 %v1729_v3 }
 0x206   : > { %1846 = vmatmul.f32.gmra.mxu1 %v1729_v3 }
 0x20c   : > { %1887 = vmatmul.f32.gmra.mxu2 %v1729_v3 }
 0x20d   : > { %1928 = vmatmul.f32.gmra.mxu3 %v1729_v3  ;;  %1808 = vmatmul.f32.gmra.mxu0 %v1730_v4 }
 0x20e   : > { %1849 = vmatmul.f32.gmra.mxu1 %v1730_v4 }
 0x214   : > { %1890 = vmatmul.f32.gmra.mxu2 %v1730_v4 }
 0x215   : > { %1931 = vmatmul.f32.gmra.mxu3 %v1730_v4  ;;  %1811 = vmatmul.f32.gmra.mxu0 %v1731_v45 }
 0x216   : > { %1852 = vmatmul.f32.gmra.mxu1 %v1731_v45 }
 0x21c   : > { %1893 = vmatmul.f32.gmra.mxu2 %v1731_v45 }
 0x21d   : > { %1934 = vmatmul.f32.gmra.mxu3 %v1731_v45  ;;  %1814 = vmatmul.f32.gmra.mxu0 %v1732_v39 }
 0x21e   : > { %1855 = vmatmul.f32.gmra.mxu1 %v1732_v39 }
 0x224   : > { %1896 = vmatmul.f32.gmra.mxu2 %v1732_v39 }
 0x225   : > { %1937 = vmatmul.f32.gmra.mxu3 %v1732_v39  ;;  %1817 = vmatmul.f32.gmra.mxu0 %v1733_v20 }
 0x226   : > { %1858 = vmatmul.f32.gmra.mxu1 %v1733_v20 }
 0x22c   : > { %1899 = vmatmul.f32.gmra.mxu2 %v1733_v20 }
 0x22d   : > { %1940 = vmatmul.f32.gmra.mxu3 %v1733_v20  ;;  %1820 = vmatmul.f32.gmra.mxu0 %v1734_v60 }
 0x22e   : > { %1861 = vmatmul.f32.gmra.mxu1 %v1734_v60 }
 0x234   : > { %1902 = vmatmul.f32.gmra.mxu2 %v1734_v60 }
 0x235   : > { %1943 = vmatmul.f32.gmra.mxu3 %v1734_v60 }
 0x272   : > { %v1800_v38 = vpop.f32.mrf.mxu0 }
 0x273   : > { %v1841_v41 = vpop.f32.mrf.mxu1  ;;  %v1801_v17 = vadd.f32 %v1800_v38, %v1746_v49 }
 0x274   : > { %v1842_v59 = vadd.f32 %v1841_v41, %v1746_v49 }
 0x275   : > { %2605 = vtanh.f32 %v1801_v17 }
 0x276   : > { %2607 = vtanh.f32 %v1842_v59 }
 0x27a   : > { %v1803_v40 = vpop.f32.mrf.mxu0 }
 0x27b   : > { %v1844_v51 = vpop.f32.mrf.mxu1  ;;  %v1804_v28 = vadd.f32 %v1803_v40, %v1751_v58  ;;  %v3940_v30 = vpop.eup %2605 }
 0x27c   : > { %v1845_v53 = vadd.f32 %v1844_v51, %v1751_v58  ;;  %v3942_v24 = vpop.eup %2607  ;;  %v2031_v45 = vmul.f32 %v3940_v30, %v3940_v30 }
 0x27d   : > { %2609 = vtanh.f32 %v1804_v28  ;;  %v2032_v38 = vmul.f32 %v3942_v24, %v3942_v24 }
 0x27e   : > { %2611 = vtanh.f32 %v1845_v53 }
 0x27f   : > { %v1882_v29 = vpop.f32.mrf.mxu2 }
 0x280   : > { %v1923_v11 = vpop.f32.mrf.mxu3  ;;  %v1883_v21 = vadd.f32 %v1882_v29, %v1746_v49 }
 0x281   : > { %v1924_v9 = vadd.f32 %v1923_v11, %v1746_v49 }
 0x282   : > { %v1806_v63 = vpop.f32.mrf.mxu0  ;;  %2613 = vtanh.f32 %v1883_v21 }
 0x283   : > { %v1847_v0 = vpop.f32.mrf.mxu1  ;;  %v1807_v31 = vadd.f32 %v1806_v63, %v1756_v48  ;;  %v3944_v6 = vpop.eup %2609 }
 0x284   : > { %v1848_v52 = vadd.f32 %v1847_v0, %v1756_v48  ;;  %v3946_v54 = vpop.eup %2611  ;;  %v2035_v23 = vmul.f32 %v3944_v6, %v3944_v6 }
 0x285   : > { %2615 = vtanh.f32 %v1807_v31  ;;  %v2036_v18 = vmul.f32 %v3946_v54, %v3946_v54 }
 0x286   : > { %2617 = vtanh.f32 %v1848_v52  ;;  %v2047_v29 = vadd.f32 %v2035_v23, %v2031_v45 }
 0x287   : > { %v1885_v50 = vpop.f32.mrf.mxu2  ;;  %v2056_v0 = vadd.f32 %v2036_v18, %v2032_v38 }
 0x288   : > { %v1926_v2 = vpop.f32.mrf.mxu3  ;;  %v1886_v42 = vadd.f32 %v1885_v50, %v1751_v58  ;;  %v3952_v5 = vpop.eup %2613 }
 0x289   : > { %v1927_v15 = vadd.f32 %v1926_v2, %v1751_v58 }
 0x28a   : > { %v1809_v36 = vpop.f32.mrf.mxu0 }
 0x28b   : > { %v1850_v34 = vpop.f32.mrf.mxu1  ;;  %v1810_v8 = vadd.f32 %v1809_v36, %v3936_v1  ;;  %v3955_v16 = vpop.eup %2615 }
 0x28c   : > { %v1851_v57 = vadd.f32 %v1850_v34, %v3936_v1  ;;  %v3958_v14 = vpop.eup %2617  ;;  %v2039_v39 = vmul.f32 %v3955_v16, %v3955_v16 }
 0x28d   : > { %2619 = vtanh.f32 %v1810_v8  ;;  %v2040_v41 = vmul.f32 %v3958_v14, %v3958_v14 }
 0x28e   : > { %2621 = vtanh.f32 %v1851_v57  ;;  %v2048_v34 = vadd.f32 %v2047_v29, %v2039_v39 }
 0x28f   : > { %v1888_v10 = vpop.f32.mrf.mxu2  ;;  %2623 = vtanh.f32 %v1924_v9 }
 0x290   : > { %v1929_v13 = vpop.f32.mrf.mxu3  ;;  %v1889_v44 = vadd.f32 %v1888_v10, %v1756_v48  ;;  %2625 = vtanh.f32 %v1886_v42 }
 0x291   : > { %v1930_v47 = vadd.f32 %v1929_v13, %v1756_v48  ;;  %2627 = vtanh.f32 %v1927_v15  ;;  %v2057_v13 = vadd.f32 %v2056_v0, %v2040_v41  ;;  %v2033_v48 = vmul.f32 %v3952_v5, %v3952_v5 }
 0x292   : > { %v1812_v61 = vpop.f32.mrf.mxu0  ;;  %2629 = vtanh.f32 %v1889_v44 }
 0x293   : > { %v1853_v37 = vpop.f32.mrf.mxu1  ;;  %v1813_v7 = vadd.f32 %v1812_v61, %v3934_v43  ;;  %v3965_v12 = vpop.eup %2619  ;;  %2631 = vtanh.f32 %v1930_v47 }
 0x294   : > { %v1854_v22 = vadd.f32 %v1853_v37, %v3934_v43  ;;  %v3970_v4 = vpop.eup %2621  ;;  %v2043_v11 = vmul.f32 %v3965_v12, %v3965_v12  ;;  %v4002_v61 = vpop.permute.xlu2 %1780 }
 0x295   : > { %2633 = vtanh.f32 %v1813_v7  ;;  %v3977_v60 = vpop.eup %2623  ;;  %v2044_v49 = vmul.f32 %v3970_v4, %v3970_v4 }
 0x296   : > { %2635 = vtanh.f32 %v1854_v22  ;;  %v3984_v51 = vpop.eup %2625  ;;  %v2049_v28 = vadd.f32 %v2048_v34, %v2043_v11 }
 0x297   : > { %v3930_v55 = vpop.f32.mrf.mxu2  ;;  %v3988_v63 = vpop.eup %2627  ;;  %v2037_v37 = vmul.f32 %v3984_v51, %v3984_v51  ;;  %v2058_v21 = vadd.f32 %v2057_v13, %v2044_v49 }
 0x298   : > { %v3932_v26 = vpop.f32.mrf.mxu3  ;;  %v3992_v36 = vpop.eup %2629  ;;  %v1892_v58 = vadd.f32 %v3930_v55, %v3936_v1  ;;  %v2050_v42 = vrot.slane %v2049_v28, 4 }
 0x299   : > { %v3996_v10 = vpop.eup %2631  ;;  %v1933_v17 = vadd.f32 %v3932_v26, %v3936_v1  ;;  %v2038_v26 = vmul.f32 %v3988_v63, %v3988_v63  ;;  %v2059_v44 = vrot.slane %v2058_v21, 4  ;;  %v2041_v18 = vmul.f32 %v3992_v36, %v3992_v36 }
 0x29a   : > { %v1815_v35 = vpop.f32.mrf.mxu0  ;;  %v2051_v38 = vadd.f32 %v2050_v42, %v2049_v28 }
 0x29b   : > { %v1856_v33 = vpop.f32.mrf.mxu1  ;;  %v1816_v19 = vadd.f32 %v1815_v35, %v3928_v32  ;;  %v4000_v59 = vpop.eup %2633  ;;  %v2034_v35 = vmul.f32 %v3977_v60, %v3977_v60  ;;  %v2060_v29 = vadd.f32 %v2059_v44, %v2058_v21 }
 0x29c   : > { %v1857_v25 = vadd.f32 %v1856_v33, %v3928_v32  ;;  %v4006_v53 = vpop.eup %2635  ;;  %v2065_v33 = vadd.f32 %v2037_v37, %v2033_v48  ;;  %v2083_v45 = vmul.f32 %v4000_v59, %v4000_v59  ;;  %v2052_v21 = vrot.slane %v2051_v38, 2 }
 0x29d   : > { %2637 = vtanh.f32 %v1816_v19  ;;  %v2074_v19 = vadd.f32 %v2038_v26, %v2034_v35  ;;  %v2084_v41 = vmul.f32 %v4006_v53, %v4006_v53 }
 0x29e   : > { %2639 = vtanh.f32 %v1857_v25 }
 0x29f   : > { %v3948_v62 = vpop.f32.mrf.mxu2 }
 0x2a0   : > { %v3950_v46 = vpop.f32.mrf.mxu3  ;;  %v1895_v7 = vadd.f32 %v3948_v62, %v3934_v43 }
 0x2a2   : > { %v1818_v56 = vpop.f32.mrf.mxu0 }
 0x2a3   : > { %v1859_v3 = vpop.f32.mrf.mxu1  ;;  %v1819_v20 = vadd.f32 %v1818_v56, %v3960_v27  ;;  %v4010_v52 = vpop.eup %2637  ;;  %v1936_v56 = vadd.f32 %v3950_v46, %v3934_v43 }
 0x2a4   : > { %v1860_v40 = vadd.f32 %v1859_v3, %v3960_v27  ;;  %v4016_v57 = vpop.eup %2639  ;;  %v2087_v47 = vmul.f32 %v4010_v52, %v4010_v52  ;;  %v2042_v3 = vmul.f32 %v3996_v10, %v3996_v10 }
 0x2a5   : > { %2641 = vtanh.f32 %v1819_v20  ;;  %v2088_v25 = vmul.f32 %v4016_v57, %v4016_v57 }
 0x2a6   : > { %2643 = vtanh.f32 %v1860_v40  ;;  %v2099_v11 = vadd.f32 %v2087_v47, %v2083_v45 }
 0x2a7   : > { %v1897_v50 = vpop.f32.mrf.mxu2  ;;  %2645 = vtanh.f32 %v1892_v58  ;;  %v2108_v34 = vadd.f32 %v2088_v25, %v2084_v41  ;;  %v2053_v25 = vadd.f32 %v2052_v21, %v2051_v38  ;;  %v1984_v21 = vmul.f32 %v4016_v57, %v3946_v54 }
 0x2a8   : > { %v1938_v2 = vpop.f32.mrf.mxu3  ;;  %2647 = vtanh.f32 %v1933_v17  ;;  %v1898_v39 = vadd.f32 %v1897_v50, %v3928_v32  ;;  %v2066_v50 = vadd.f32 %v2065_v33, %v2041_v18 }
 0x2a9   : > { %v1939_v46 = vadd.f32 %v1938_v2, %v3928_v32 }
 0x2aa   : > { %v1821_v31 = vpop.f32.mrf.mxu0 }
 0x2ab   : > { %v1862_v55 = vpop.f32.mrf.mxu1  ;;  %v1822_v1 = vadd.f32 %v1821_v31, %v4002_v61  ;;  %v4018_v9 = vpop.eup %2641 }
 0x2ac   : > { %v1863_v8 = vadd.f32 %v1862_v55, %v4002_v61  ;;  %v4022_v15 = vpop.eup %2643  ;;  %v2091_v62 = vmul.f32 %v4018_v9, %v4018_v9 }
 0x2ad   : > { %2649 = vtanh.f32 %v1822_v1  ;;  %v4041_v20 = vpop.eup %2645  ;;  %v2092_v43 = vmul.f32 %v4022_v15, %v4022_v15  ;;  %v2075_v1 = vadd.f32 %v2074_v19, %v2042_v3  ;;  %v4068_v19 = vmul.f32 %v4000_v59, %v3940_v30 }
 0x2ae   : > { %2651 = vtanh.f32 %v1863_v8  ;;  %v4048_v40 = vpop.eup %2647  ;;  %v2045_v17 = vmul.f32 %v4041_v20, %v4041_v20  ;;  %v2100_v32 = vadd.f32 %v2099_v11, %v2091_v62 }
 0x2af   : > { %v1900_v22 = vpop.f32.mrf.mxu2  ;;  %2653 = vtanh.f32 %v1895_v7  ;;  %v2046_v37 = vmul.f32 %v4048_v40, %v4048_v40  ;;  %v2109_v28 = vadd.f32 %v2108_v34, %v2092_v43 }
 0x2b0   : > { %v1941_v23 = vpop.f32.mrf.mxu3  ;;  %v1901_v0 = vadd.f32 %v1900_v22, %v3960_v27  ;;  %2655 = vtanh.f32 %v1936_v56  ;;  %v2067_v33 = vadd.f32 %v2066_v50, %v2045_v17 }
 0x2b1   : > { %v1942_v58 = vadd.f32 %v1941_v23, %v3960_v27  ;;  %2657 = vtanh.f32 %v1898_v39  ;;  %v2061_v27 = vrot.slane %v2060_v29, 2  ;;  %v2076_v7 = vadd.f32 %v2075_v1, %v2046_v37 }
 0x2b2   : > { %2659 = vtanh.f32 %v1939_v46  ;;  %v2068_v3 = vrot.slane %v2067_v33, 4 }
 0x2b3   : > { %v4051_v49 = vpop.eup %2649  ;;  %2661 = vtanh.f32 %v1901_v0  ;;  %v2062_v56 = vadd.f32 %v2061_v27, %v2060_v29  ;;  %v2077_v11 = vrot.slane %v2076_v7, 4 }
 0x2b4   : > { %v4054_v13 = vpop.eup %2651  ;;  %v2095_v2 = vmul.f32 %v4051_v49, %v4051_v49  ;;  %2663 = vtanh.f32 %v1942_v58  ;;  %v1980_v58 = vmul.f32 %v4006_v53, %v3942_v24  ;;  %v2069_v30 = vadd.f32 %v2068_v3, %v2067_v33 }
 0x2b5   : > { %v2096_v48 = vmul.f32 %v4054_v13, %v4054_v13  ;;  %v2654_v35 = vpop.eup %2653  ;;  %v2063_v34 = vrot.slane %v2062_v56, 1  ;;  %v1983_v24 = vmul.f32 %v4010_v52, %v3944_v6 }
 0x2b6   : > { %v2101_v31 = vadd.f32 %v2100_v32, %v2095_v2  ;;  %v2656_v47 = vpop.eup %2655  ;;  %v2085_v17 = vmul.f32 %v2654_v35, %v2654_v35  ;;  %v2004_v54 = vadd.f32 %v1984_v21, %v1980_v58 }
 0x2b7   : > { %v1903_v55 = vpop.f32.mrf.mxu2  ;;  %v2110_v8 = vadd.f32 %v2109_v28, %v2096_v48  ;;  %v2658_v18 = vpop.eup %2657  ;;  %v2086_v59 = vmul.f32 %v2656_v47, %v2656_v47  ;;  %v2078_v48 = vadd.f32 %v2077_v11, %v2076_v7  ;;  %v2064_v1 = vadd.f32 %v2063_v34, %v2062_v56 }
 0x2b8   : > { %v1944_v26 = vpop.f32.mrf.mxu3  ;;  %v2102_v42 = vrot.slane %v2101_v31, 4  ;;  %v1904_v44 = vadd.f32 %v1903_v55, %v4002_v61  ;;  %v2660_v62 = vpop.eup %2659  ;;  %v2089_v0 = vmul.f32 %v2658_v18, %v2658_v18  ;;  %v1982_v56 = vmul.f32 %v2656_v47, %v3977_v60 }
 0x2b9   : > { %v2111_v22 = vrot.slane %v2110_v8, 4  ;;  %v1945_v23 = vadd.f32 %v1944_v26, %v4002_v61  ;;  %v2662_v41 = vpop.eup %2661  ;;  %v2054_v61 = vrot.slane %v2053_v25, 1  ;;  %v2090_v38 = vmul.f32 %v2660_v62, %v2660_v62 }
 0x2ba   : > { %v2103_v45 = vadd.f32 %v2102_v42, %v2101_v31  ;;  %2665 = vtanh.f32 %v1904_v44  ;;  %v2664_v46 = vpop.eup %2663  ;;  %v2093_v2 = vmul.f32 %v2662_v41, %v2662_v41  ;;  %v2117_v27 = vadd.f32 %v2089_v0, %v2085_v17 }
 0x2bb   : > { %v2112_v39 = vadd.f32 %v2111_v22, %v2110_v8  ;;  %2667 = vtanh.f32 %v1945_v23  ;;  %v2094_v28 = vmul.f32 %v2664_v46, %v2664_v46  ;;  %v2055_v26 = vadd.f32 %v2054_v61, %v2053_v25 }
 0x2bc   : > { %v2104_v43 = vrot.slane %v2103_v45, 2  ;;  %v2126_v8 = vadd.f32 %v2090_v38, %v2086_v59  ;;  %v2118_v33 = vadd.f32 %v2117_v27, %v2093_v2  ;;  %v2070_v23 = vrot.slane %v2069_v30, 2 }
 0x2bd   : > { %v2113_v50 = vrot.slane %v2112_v39, 2  ;;  %v2079_v3 = vrot.slane %v2078_v48, 2  ;;  %v1981_v25 = vmul.f32 %v2654_v35, %v3952_v5  ;;  %v1988_v11 = vmul.f32 %v4022_v15, %v3958_v14 }
 0x2be   : > { %v2105_v29 = vadd.f32 %v2104_v43, %v2103_v45  ;;  %v2127_v7 = vadd.f32 %v2126_v8, %v2094_v28  ;;  %v1985_v6 = vmul.f32 %v2658_v18, %v3984_v51  ;;  %v1986_v52 = vmul.f32 %v2660_v62, %v3988_v63 }
 0x2bf   : > { %v2114_v32 = vadd.f32 %v2113_v50, %v2112_v39  ;;  %v2071_v34 = vadd.f32 %v2070_v23, %v2069_v30  ;;  %v2080_v35 = vadd.f32 %v2079_v3, %v2078_v48  ;;  %v1989_v14 = vmul.f32 %v2662_v41, %v3992_v36 }
 0x2c0   : > { %v2106_v37 = vrot.slane %v2105_v29, 1  ;;  %v2666_v55 = vpop.eup %2665  ;;  %v1987_v51 = vmul.f32 %v4018_v9, %v3955_v16  ;;  %v2005_v63 = vadd.f32 %v2004_v54, %v1988_v11  ;;  %v1990_v15 = vmul.f32 %v2664_v46, %v3996_v10 }
 0x2c1   : > { %v2115_v31 = vrot.slane %v2114_v32, 1  ;;  %v2668_v44 = vpop.eup %2667  ;;  %v2097_v22 = vmul.f32 %v2666_v55, %v2666_v55  ;;  %v2013_v18 = vadd.f32 %v1985_v6, %v1981_v25  ;;  %v2022_v62 = vadd.f32 %v1986_v52, %v1982_v56 }
 0x2c2   : > { %v2107_v42 = vadd.f32 %v2106_v37, %v2105_v29  ;;  %v2098_v39 = vmul.f32 %v2668_v44, %v2668_v44  ;;  %v1992_v29 = vmul.f32 %v4054_v13, %v3970_v4  ;;  %v1993_v58 = vmul.f32 %v2666_v55, %v4041_v20 }
 0x2c3   : > { %v2116_v53 = vadd.f32 %v2115_v31, %v2114_v32  ;;  %v2119_v43 = vadd.f32 %v2118_v33, %v2097_v22  ;;  %v1994_v13 = vmul.f32 %v2668_v44, %v4048_v40  ;;  %v2072_v36 = vrot.slane %v2071_v34, 1 }
 0x2c4   : > { %v2135_v45 = vmul.f32 %v2107_v42, %v2055_v26  ;;  %v2128_v0 = vadd.f32 %v2127_v7, %v2098_v39  ;;  %v2006_v4 = vadd.f32 %v2005_v63, %v1992_v29  ;;  %v1995_v41 = vadd.f32 %v1983_v24, %v4068_v19 }
 0x2c5   : > { %v2136_v57 = vmul.f32 %v2116_v53, %v2064_v1  ;;  %v2120_v61 = vrot.slane %v2119_v43, 4  ;;  %v2014_v2 = vadd.f32 %v2013_v18, %v1989_v14  ;;  %v2081_v9 = vrot.slane %v2080_v35, 1 }
 0x2c6   : > { %v4084_v38 = vadd.f32 1e-12, %v2135_v45  ;;  %v2129_v5 = vrot.slane %v2128_v0, 4  ;;  %v1991_v10 = vmul.f32 %v4051_v49, %v3965_v12  ;;  %v2023_v46 = vadd.f32 %v2022_v62, %v1990_v15 }
 0x2c7   : > { %v4082_v50 = vadd.f32 1e-12, %v2136_v57  ;;  %v2121_v60 = vadd.f32 %v2120_v61, %v2119_v43  ;;  %v1996_v20 = vadd.f32 %v1995_v41, %v1987_v51  ;;  %v2015_v37 = vadd.f32 %v2014_v2, %v1993_v58 }
 0x2c8   : > { %v2130_v47 = vadd.f32 %v2129_v5, %v2128_v0  ;;  %v2007_v48 = vrot.slane %v2006_v4, 4  ;;  %v2024_v21 = vadd.f32 %v2023_v46, %v1994_v13  ;;  %v2073_v19 = vadd.f32 %v2072_v36, %v2071_v34 }
 0x2c9   : > { %2669 = vrsqrt.f32 %v4082_v50  ;;  %v2122_v17 = vrot.slane %v2121_v60, 2  ;;  %v2082_v26 = vadd.f32 %v2081_v9, %v2080_v35  ;;  %v1997_v1 = vadd.f32 %v1996_v20, %v1991_v10 }
 0x2ca   : > { %2671 = vrsqrt.f32 %v4084_v38  ;;  %v2131_v32 = vrot.slane %v2130_v47, 2  ;;  %v2016_v49 = vrot.slane %v2015_v37, 4  ;;  %v2008_v44 = vadd.f32 %v2007_v48, %v2006_v4 }
 0x2cb   : > { %v2123_v16 = vadd.f32 %v2122_v17, %v2121_v60  ;;  %v2025_v24 = vrot.slane %v2024_v21, 4  ;;  %v1998_v23 = vrot.slane %v1997_v1, 4  ;;  %vm2159_vm2 = vweird.f32 %v4082_v50 }
 0x2cc   : > { %v2132_v30 = vadd.f32 %v2131_v32, %v2130_v47  ;;  %v2017_v7 = vadd.f32 %v2016_v49, %v2015_v37  ;;  %v2009_v3 = vrot.slane %v2008_v44, 2  ;;  %vm2149_vm6 = vweird.f32 %v4084_v38 }
 0x2cd   : > { %v2124_v28 = vrot.slane %v2123_v16, 1  ;;  %v2026_v54 = vadd.f32 %v2025_v24, %v2024_v21  ;;  %v1999_v43 = vadd.f32 %v1998_v23, %v1997_v1 }
 0x2ce   : > { %v2133_v27 = vrot.slane %v2132_v30, 1  ;;  %v2018_v25 = vrot.slane %v2017_v7, 2  ;;  %v2010_v11 = vadd.f32 %v2009_v3, %v2008_v44 }
 0x2cf   : > { %v4099_v59 = vpop.eup %2669  ;;  %v2125_v31 = vadd.f32 %v2124_v28, %v2123_v16  ;;  %v2027_v0 = vrot.slane %v2026_v54, 2  ;;  %v2000_v34 = vrot.slane %v1999_v43, 2 }
 0x2d0   : > { %v2154_v40 = vmul.f32 %v4099_v59, %v4082_v50  ;;  %v4103_v55 = vpop.eup %2671  ;;  %v2134_v12 = vadd.f32 %v2133_v27, %v2132_v30  ;;  %v2019_v5 = vadd.f32 %v2018_v25, %v2017_v7  ;;  %vm2160_vm1 = vweird.f32 %v4099_v59 }
 0x2d1   : > { %v2137_v8 = vmul.f32 %v2125_v31, %v2073_v19  ;;  %v2144_v22 = vmul.f32 %v4103_v55, %v4084_v38  ;;  %v2011_v60 = vrot.slane %v2010_v11, 1  ;;  %v2028_v51 = vadd.f32 %v2027_v0, %v2026_v54  ;;  %vm4113_vm3 = vmor %vm2159_vm2, %vm2160_vm1 }
 0x2d2   : > { %v2155_v42 = vmul.f32 %v4099_v59, %v2154_v40  ;;  %v2138_v53 = vmul.f32 %v2134_v12, %v2082_v26  ;;  %v2001_v18 = vadd.f32 %v2000_v34, %v1999_v43  ;;  %v2020_v17 = vrot.slane %v2019_v5, 1 }
 0x2d3   : > { %v2141_v33 = vadd.f32 1e-12, %v2137_v8  ;;  %v2145_v57 = vmul.f32 %v4103_v55, %v2144_v22  ;;  %vm2150_vm4 = vweird.f32 %v4103_v55  ;;  %v2029_v32 = vrot.slane %v2028_v51, 1 }
 0x2d4   : > { %v2142_v45 = vadd.f32 1e-12, %v2138_v53  ;;  %v2156_v39 = vmul.f32 0.5, %v2155_v42  ;;  %v2012_v36 = vadd.f32 %v2011_v60, %v2010_v11  ;;  %v2002_v16 = vrot.slane %v2001_v18, 1  ;;  %vm4128_vm8 = vmor %vm2149_vm6, %vm2150_vm4 }
 0x2d5   : > { %2673 = vrsqrt.f32 %v2141_v33  ;;  %v2146_v52 = vmul.f32 0.5, %v2145_v57  ;;  %vm2169_vm9 = vweird.f32 %v2141_v33  ;;  %v2021_v30 = vadd.f32 %v2020_v17, %v2019_v5 }
 0x2d6   : > { %2675 = vrsqrt.f32 %v2142_v45  ;;  %v2157_v56 = vsub.f32 1.5, %v2156_v39  ;;  %vm2179_vm11 = vweird.f32 %v2142_v45  ;;  %v2030_v20 = vadd.f32 %v2029_v32, %v2028_v51 }
 0x2d7   : > { %v2147_v15 = vsub.f32 1.5, %v2146_v52  ;;  %v2201_v40 = vlaneseq  ;;  %v2003_v21 = vadd.f32 %v2002_v16, %v2001_v18 }
 0x2d8   : > { %v2158_v14 = vmul.f32 %v4099_v59, %v2157_v56 }
 0x2d9   : > { %v2148_v41 = vmul.f32 %v4103_v55, %v2147_v15  ;;  %vm2203_vm0 = vcmp.lt.s32.totalorder %v2201_v40, 512 }
 0x2da   : > { %v2162_v4 = vsel %vm4113_vm3, %v4099_v59, %v2158_v14 }
 0x2db   : > { %v2674_v6 = vpop.eup %2673  ;;  %v2184_v46 = vmul.f32 %v2162_v4, %v2012_v36  ;;  %v2152_v38 = vsel %vm4128_vm8, %v4103_v55, %v2148_v41 }
 0x2dc   : > { %v2676_v61 = vpop.eup %2675  ;;  %v2164_v29 = vmul.f32 %v2674_v6, %v2141_v33  ;;  %vm2170_vm5 = vweird.f32 %v2674_v6  ;;  %v2183_v26 = vmul.f32 %v2152_v38, %v2003_v21 }
 0x2dd   : > { %v2174_v35 = vmul.f32 %v2676_v61, %v2142_v45  ;;  %vm2180_vm7 = vweird.f32 %v2676_v61  ;;  %vm2171_vm10 = vmor %vm2169_vm9, %vm2170_vm5  ;;  %v2191_v19 = vrot.slane %v2184_v46, 7 }
 0x2de   : > { %v2165_v63 = vmul.f32 %v2674_v6, %v2164_v29  ;;  %vm2181_vm12 = vmor %vm2179_vm11, %vm2180_vm7 }
 0x2df   : > { %v2175_v47 = vmul.f32 %v2676_v61, %v2174_v35  ;;  %v2195_v12 = vsel %vm2194_vm13, %v2183_v26, %v2191_v19 }
 0x2e0   : > { %v2166_v58 = vmul.f32 0.5, %v2165_v63 }
 0x2e1   : > { %v2176_v13 = vmul.f32 0.5, %v2175_v47 }
 0x2e2   : > { %v2167_v50 = vsub.f32 1.5, %v2166_v58 }
 0x2e3   : > { %v2177_v2 = vsub.f32 1.5, %v2176_v13 }
 0x2e4   : > { %v2168_v10 = vmul.f32 %v2674_v6, %v2167_v50 }
 0x2e5   : > { %v2178_v59 = vmul.f32 %v2676_v61, %v2177_v2 }
 0x2e6   : > { %v2172_v37 = vsel %vm2171_vm10, %v2674_v6, %v2168_v10 }
 0x2e7   : > { %v2182_v28 = vsel %vm2181_vm12, %v2676_v61, %v2178_v59  ;;  %v2185_v48 = vmul.f32 %v2172_v37, %v2021_v30 }
 0x2e8   : > { %v2186_v27 = vmul.f32 %v2182_v28, %v2030_v20 }
 0x2e9   : > { %v2192_v31 = vrot.slane %v2185_v48, 6 }
 0x2ea   : > { %v2193_v1 = vrot.slane %v2186_v27, 5 }
 0x2ec   : > { %v2197_v55 = vsel %vm2196_vm14, %v2192_v31, %v2193_v1 }
 0x2ed   : > { %v2199_v49 = vsel %vm2198_vm15, %v2195_v12, %v2197_v55 }
 0x2ee   : > { %2205 = vst.msk [vmem:[%s312_s17] sm:$0xf] %vm2203_vm0, %v2199_v49 }
 0x2ef   : > { %2704 = shalt.err (!%p2701_p3)
}
 0x2f0   : > { %2562 = dma.vmem_to_hbm [thread:$0]  (%p2820_p5), %s2220_s13, 64, %s2222_s14, %s2207_s19  }
 0x2f1 PF: > { %p2568_p4 = scmp.ge.s32.totalorder %s2739_s27, 2  ;;  %s2233_s29 = sand.u32 1, %s2727_s24  }
 0x2f2   : > { %s2234_s15 = scalar_lea.sflag [#allocation3], %s2233_s29 }
 0x2f3   : > { %p2565_p7 = pnand %p2568_p4, %p2824_p6 }
 0x2f5   : > { %p2566_p8 = pneg %p2565_p7 }
 0x2f7   : > { %2722 = dma.done.wait (%p2566_p8), %s2234_s15, 64  }
 0x2f8   : > { %2724 = vsyncadd (%p2566_p8), %s2234_s15, 4294967232  ;;  %p17_p9 = scmp.ge.s32.totalorder %s2807_s30, 6   ;;  %s4359_s24 = smov %s2731_s25 }
 0x2f9   : > { %s4360_s25 = smov %s2735_s26  ;;  %s4361_s26 = smov %s2818_s10 }
 0x2fa   : > { %s4362_s27 = smov %s2807_s30  ;;  %19 = sbr.rel (!%p17_p9) target bundleno = 3 (0x3), region = 86 }
 0x2ff   :  { %2240 = vsyncpa [#allocation3], 1 }
 0x300   :  { %2242 = vsyncpa [#allocation3 + $0x1], 1 }

</bundles_post_ra>
